<compile_context>
chip_gen: v7x
topology: tpu7x:2x2x1
jax: 0.10.0
libtpu: 0.0.40
codegen_flags: <defaults>
</compile_context>

<pallas_src>
import jax
import jax.numpy as jnp
from jax.experimental import pallas as pl
from jax.experimental.pallas import tpu as pltpu


def _make_nearest_kernel(sh: int, sw: int, chunk_rows: int, n_chunks: int):
    """Kernel: (rb, Win) input rows -> (rb, sh*Win*sw) flat upsampled rows."""

    def emit_chunk(x_chunk, o_ref, row_slice):
        rows, w = x_chunk.shape
        if sw > 1:
            # Replicate each pixel sw times along the lane (width) axis.
            w_rep = jnp.broadcast_to(
                x_chunk[:, :, None], (rows, w, sw)).reshape(rows, w * sw)
        else:
            w_rep = x_chunk
        seg = w * sw
        # Store the widened chunk sh times directly (no concat): keeps the
        # write path a single stream through the vst slot, no extra
        # output-sized live value.
        for r in range(sh):
            o_ref[row_slice, r * seg:(r + 1) * seg] = w_rep

    def kernel(x_ref, o_ref):
        if n_chunks == 1:
            emit_chunk(x_ref[...], o_ref, slice(None))
        else:
            # Strip-mine the tile: bounded live ranges -> no VMEM spills.
            def body(c, carry):
                start = pl.multiple_of(c * chunk_rows, chunk_rows)
                rows = pl.ds(start, chunk_rows)
                emit_chunk(x_ref[rows, :], o_ref, rows)
                return carry

            jax.lax.fori_loop(0, n_chunks, body, 0, unroll=(n_chunks <= 8))

    return kernel


def _vmem_capacity_bytes() -> int:
    """Physical per-core VMEM (128 MiB on v5e/v6e, 64 MiB on v7x)."""
    try:
        cap = int(pltpu.get_tpu_info().vmem_capacity_bytes)
        if cap > 0:
            return cap
    except Exception:
        pass
    return 128 << 20


def _choose_tiling(num_rows, in_w, out_w, itemsize, tile_target_bytes):
    """Pick (rows_per_block, chunk_rows) for the flat-row problem."""
    itemsize = int(itemsize)
    # Sub-32-bit dtypes pack sublanes in pairs/quads: keep row counts aligned
    # (8 for f32, 16 for bf16, 32 for int8/fp8).
    row_align = 8 * max(1, 4 // itemsize)
    row_bytes = (in_w + out_w) * itemsize

    # Strip-mine granularity: ~64 KiB of live (input + widened) data per chunk.
    chunk_rows = max(row_align, ((64 << 10) // row_bytes) // row_align * row_align)

    # Cap the block so the grid has >= 2 steps whenever possible: on v7x the
    # 'parallel' axis is what shards work across the two TensorCores.
    half_aligned = None
    if num_rows >= 2 * row_align:
        half_aligned = max(row_align, (num_rows // 2) // row_align * row_align)
        chunk_rows = min(chunk_rows, half_aligned)

    rb = max(chunk_rows,
             (int(tile_target_bytes) // row_bytes) // chunk_rows * chunk_rows)
    if half_aligned is not None:
        rb = min(rb, half_aligned)
    # Keep rb an exact multiple of the chunk so the in-kernel loop has no tail.
    rb = max(chunk_rows, (rb // chunk_rows) * chunk_rows)
    return rb, chunk_rows


def interpolate_nearest(x, scale_factor, *, block_target_bytes=None):
    """Nearest-neighbor upsampling of an NCHW tensor by integer factors."""
    assert x.ndim == 4, "expected NCHW input"

    if isinstance(scale_factor, (tuple, list)):
        sf = tuple(scale_factor)
    else:
        sf = (scale_factor, scale_factor)
    assert len(sf) == 2, "expected scalar or 2-tuple scale_factor for NCHW input"
    for s in sf:
        # TODO(synk): non-integer scale factors are not implemented.
        assert float(s) == int(float(s)) and int(float(s)) >= 1, (
            "only exact positive integer scale factors are supported")
    sh, sw = int(float(sf[0])), int(float(sf[1]))

    N, C, H, W = x.shape
    G = N * C * H                              # total image rows
    itemsize = jnp.dtype(x.dtype).itemsize

    # Lane-density packing (sh == 1 only): pack k image rows per kernel row so
    # both the input row (k*W) and output row (k*W*sw) are lane-dense.
    k = 1
    if sh == 1 and W * sw < 128 and G > 1:
        k_target = min(G, pl.cdiv(128, W))
        for cand in range(k_target, 1, -1):
            if G % cand == 0:
                k = cand
                break

    rows = G // k
    in_w = k * W
    out_w = sh * in_w * sw                     # flat lane-dense output row

    vmem_cap = _vmem_capacity_bytes()
    if block_target_bytes is None:
        # ~16 MiB tiles on 128-MiB VMEM parts, ~8 MiB on 64-MiB v7x.
        block_target_bytes = min(16 << 20, vmem_cap // 8)
    vmem_limit = min(vmem_cap // 2, 64 << 20)

    rb, chunk_rows = _choose_tiling(rows, in_w, out_w, itemsize,
                                    block_target_bytes)
    n_chunks = rb // chunk_rows
    nb = pl.cdiv(rows, rb)

    x_rows = x.reshape(rows, in_w)             # free contiguous reshape

    bytes_accessed = G * W * itemsize * (1 + sh * sw)

    out_rows = pl.pallas_call(
        _make_nearest_kernel(sh, sw, chunk_rows, n_chunks),
        out_shape=jax.ShapeDtypeStruct((rows, out_w), x.dtype),
        grid=(nb,),
        in_specs=[pl.BlockSpec((rb, in_w), lambda i: (i, 0))],
        out_specs=pl.BlockSpec((rb, out_w), lambda i: (i, 0)),
        compiler_params=pltpu.CompilerParams(
            dimension_semantics=("parallel",),
            vmem_limit_bytes=vmem_limit,
        ),
        cost_estimate=pl.CostEstimate(
            flops=0, transcendentals=0, bytes_accessed=bytes_accessed),
    )(x_rows)

    # Free contiguous reshape: row-major layout matches (N, C, H*sh, W*sw).
    return out_rows.reshape(N, C, H * sh, W * sw)


class Interpolate:
    """JAX/Pallas equivalent of the PyTorch Interpolate helper (nearest mode)."""

    def __init__(self, scale_factor, mode: str = "nearest"):
        if mode != "nearest":
            # TODO(synk): non-'nearest' modes (bilinear, etc.) not implemented.
            raise NotImplementedError("only 'nearest' interpolation is implemented")
        self.scale_factor = scale_factor
        self.mode = mode

    def __call__(self, inputs):
        return interpolate_nearest(inputs, self.scale_factor)


if __name__ == "__main__":
    key = jax.random.PRNGKey(0)

    # Case 1: NCHW, integer scale_factor=2 (module default usage).
    N, C, H, W = 2, 4, 16, 16
    scale = 2
    x = jax.random.normal(key, (N, C, H, W), dtype=jnp.float32)
    module = Interpolate(scale_factor=scale, mode="nearest")
    out = jax.block_until_ready(module(x))
    ref = jnp.repeat(jnp.repeat(x, scale, axis=2), scale, axis=3)
    assert out.shape == (N, C, H * scale, W * scale), out.shape
    assert out.dtype == x.dtype
    assert jnp.array_equal(out, ref), "mismatch vs reference (scale=2)"

    # Case 2: tuple scale factor + multi-block grid with a partial last block
    # (regression guard for the out-of-bounds clipping path).
    x2 = jax.random.normal(jax.random.PRNGKey(1), (1, 3, 20, 24), dtype=jnp.float32)
    out2 = jax.block_until_ready(
        interpolate_nearest(x2, (3, 2), block_target_bytes=4096))
    ref2 = jnp.repeat(jnp.repeat(x2, 3, axis=2), 2, axis=3)
    assert out2.shape == (1, 3, 60, 48), out2.shape
    assert jnp.array_equal(out2, ref2), "mismatch vs reference (scale=(3,2))"

    # Case 3: larger rows -> exercises the strip-mined (multi-chunk) body.
    x3 = jax.random.normal(jax.random.PRNGKey(2), (1, 2, 256, 256), dtype=jnp.float32)
    out3 = jax.block_until_ready(interpolate_nearest(x3, 2))
    ref3 = jnp.repeat(jnp.repeat(x3, 2, axis=2), 2, axis=3)
    assert out3.shape == (1, 2, 512, 512), out3.shape
    assert jnp.array_equal(out3, ref3), "mismatch vs reference (scale=2, large)"

    # Case 4: sh == 1 small-W path -> lane-dense row packing.
    x4 = jax.random.normal(jax.random.PRNGKey(3), (2, 3, 32, 16), dtype=jnp.float32)
    out4 = jax.block_until_ready(interpolate_nearest(x4, (1, 4)))
    ref4 = jnp.repeat(x4, 4, axis=3)
    assert out4.shape == (2, 3, 32, 64), out4.shape
    assert jnp.array_equal(out4, ref4), "mismatch vs reference (scale=(1,4))"

    print("KERNEL_OK")
</pallas_src>

<mosaic_0001>
module attributes {stable_mosaic.version = 11 : i64} {
  func.func @kernel(%arg0: i32, %arg1: memref<64x16xf32, #tpu.memory_space<vmem>>, %arg2: memref<64x64xf32, #tpu.memory_space<vmem>>) attributes {dimension_semantics = [#tpu.dimension_semantics<parallel>], iteration_bounds = array<i64: 2>, scalar_prefetch = 0 : i64, scratch_operands = 0 : i64, tpu.core_type = #tpu.core_type<tc>, window_params = [{transform_indices = @transform_0, window_bounds = array<i64: 64, 16>}, {transform_indices = @transform_1, window_bounds = array<i64: 64, 64>}]} {
    %c0 = arith.constant 0 : index
    %c0_0 = arith.constant 0 : index
    %0 = vector.load %arg1[%c0, %c0_0] : memref<64x16xf32, #tpu.memory_space<vmem>>, vector<64x16xf32>
    %1 = vector.shape_cast %0 : vector<64x16xf32> to vector<64x16x1xf32>
    %2 = vector.shape_cast %1 : vector<64x16x1xf32> to vector<64x16x1xf32>
    %3 = vector.broadcast %2 : vector<64x16x1xf32> to vector<64x16x2xf32>
    %4 = vector.shape_cast %3 : vector<64x16x2xf32> to vector<64x32xf32>
    %c0_1 = arith.constant 0 : index
    %c0_2 = arith.constant 0 : index
    %5 = vector.load %arg2[%c0_1, %c0_2] : memref<64x64xf32, #tpu.memory_space<vmem>>, vector<64x32xf32>
    tpu.vector_store %arg2[%c0_1, %c0_2], %4 {strides = array<i32>} : memref<64x64xf32, #tpu.memory_space<vmem>>, vector<64x32xf32>,
    %c0_3 = arith.constant 0 : index
    %c32 = arith.constant 32 : index
    %6 = vector.load %arg2[%c0_3, %c32] : memref<64x64xf32, #tpu.memory_space<vmem>>, vector<64x32xf32>
    tpu.vector_store %arg2[%c0_3, %c32], %4 {strides = array<i32>} : memref<64x64xf32, #tpu.memory_space<vmem>>, vector<64x32xf32>,
    return
  }
  func.func @transform_0(%arg0: i32) -> (i32, i32) {
    %c0_i32 = arith.constant 0 : i32
    %c0_i32_0 = arith.constant 0 : i32
    return %arg0, %c0_i32 : i32, i32
  }
  func.func @transform_1(%arg0: i32) -> (i32, i32) {
    %c0_i32 = arith.constant 0 : i32
    %c0_i32_0 = arith.constant 0 : i32
    return %arg0, %c0_i32 : i32, i32
  }
}

</mosaic_0001>

<bundles_post_ra>
// kernel: tpu_custom_call.1
= control target key start
LH: loop header
LB: loop body
LE: loop exit
PB: predicated region body
PF: predicated region fallthrough
CT: control target
= control target key end

     0   :  { %6 = vsyncpa [#allocation3], 0  ;;  %s6343_s0 = inlined_call_operand.hbm [shape: f32[128,16], index: 0, kind: input, shape index: {}]   ;;  %s6344_s1 = inlined_call_operand.hbm [shape: f32[128,64], index: 1, kind: output, shape index: {}]  }
   0x1   :  { %8 = vsyncpa [#allocation3 + $0x1], 0 }
   0x2   :  { %9 = vsyncpa [#allocation4], 0 }
   0x3   :  { %11 = vsyncpa [#allocation4 + $0x1], 0  ;;  %s3991_s6 = smov 0   ;;  %s3993_s7 = smov 0  }
   0x4   :  { %s3995_s8 = smov 0   ;;  %s3997_s9 = smov 0  }
   0x5 LB: > { %s4012_s10 = sadd.s32 4294967295, %s3956_s9   ;;  %s3777_s11 = sadd.s32 4294967294, %s3956_s9   ;;  %s3956_s9 = sphi %s3997_s9, %s6747_s9   ;;  %s3952_s8 = sphi %s3995_s8, %s6746_s8   ;;  %s3948_s7 = sphi %s3993_s7, %s6745_s7   ;;  %s3944_s6 = sphi %s3991_s6, %s6744_s6  }
   0x6   : > { %s4016_s12 = sadd.s32 1, %s3956_s9   ;;  %s24_s13 = sadd.s32 1, %s3952_s8 }
   0x7   : > { %s21_s14 = ssub.s32 %s3956_s9, %s4016_s12  ;;  %p31_p0 = scmp.ne.s32.totalorder %s3952_s8, %s3948_s7 }
   0x8   : > { %p22_p1 = scmp.eq.s32.totalorder %s21_s14, 0  ;;  %p32_p2 = scmp.eq.s32.totalorder %s3956_s9, 0 }
   0x9   : > { %p37_p3 = scmp.ne.s32.totalorder %s3948_s7, %s3944_s6  ;;  %p38_p4 = scmp.eq.s32.totalorder %s4012_s10, 0 }
   0xa   : > { %s4028_s15 = scalar_select %p22_p1, %s3952_s8, %s24_s13  }
   0xb   : > { %p4030_p5 = por %p32_p2, %p31_p0  ;;  %p4034_p6 = por %p38_p4, %p37_p3 }
   0xc   : > { %p61_p7 = scmp.eq.s32.totalorder %s4012_s10, 1  ;;  %p67_p8 = scmp.eq.s32.totalorder %s3777_s11, 1 }
   0xd   : > { %p3805_p10 = scmp.lt.s32.totalorder %s3956_s9, 2  ;;  %s87_s20 = sand.u32 1, %s3952_s8  }
   0xe   : > { %p4041_p11 = por %p61_p7, %p31_p0  ;;  %p4045_p12 = por %p67_p8, %p37_p3 }
   0xf   : > { %s3791_s21 = sshll.u32 %s3956_s9, 10  ;;  %s3780_s22 = sshll.u32 %s87_s20, 6 }
  0x10   : > { %s6452_s18 = scalar_select %p4041_p11, 1, 0 }
  0x11   : > { %s6453_s19 = scalar_select %p4045_p12, 1, 0 }
  0x12   : > { %s4054_s25 = scalar_lea.hbm %s6343_s0, %s3791_s21  ;;  %s91_s26 = scalar_lea.vmem [#allocation2], %s3780_s22 }
  0x13   : > { %s98_s27 = sshll.u32 %s91_s26, 4  ;;  %p4058_p13 = pnand %p3805_p10, %p4030_p5  ;;  %s4062_s27 = int_to_ptr.vmem [resolvable:$true] %s98_s27 }
  0x14   : > { %s4064_s29 = scalar_lea.sflag [#allocation3], %s87_s20  ;;  %s3860_s30 = scalar_lea.hbm %s4054_s25, 1024 }
  0x15   : > { %p3861_p0 = scmp.ne.s32.totalorder %s4054_s25, %s3860_s30  ;;  %p3862_p1 = pneg %p4058_p13 }
  0x16   : > { %s3865_s4 = scalar_lea.hbm %s6343_s0, 2048  ;;  %p3866_p4 = scmp.lt.u32.totalorder %s4054_s25, %s6343_s0 }
  0x17   : > { %p3863_p2 = pnand %p3862_p1, %p3861_p0  ;;  %p3867_p5 = scmp.lt.u32.totalorder %s3865_s4, %s3860_s30 }
  0x18   : > { %p3869_p8 = scmp.lt.u32.totalorder %s3860_s30, %s4054_s25 }
  0x19   : > { %p3864_p3 = pneg %p3863_p2  ;;  %p3868_p7 = por %p3867_p5, %p3866_p4 }
  0x1b   : > { %p3870_p10 = por %p3869_p8, %p3868_p7 }
  0x1d   : > { %p3871_p9 = pnand %p3870_p10, %p3864_p3 }
  0x1f   : > { %3874 = shalt.err (!%p3871_p9)
}
  0x20   : > { %s3875_s13 = scalar_lea.vmem %s4062_s27, 1024  ;;  %s3958_s14 = smov [#allocation2]  }
  0x21   : > { %p3876_p0 = scmp.ne.s32.totalorder %s4062_s27, %s3875_s13  ;;  %s3880_s16 = sshll.u32 %s3958_s14, 4  ;;  %s3881_s16 = int_to_ptr.vmem [resolvable:$false] %s3880_s16 }
  0x22   : > { %s3882_s20 = scalar_lea.vmem %s3881_s16, 2048  ;;  %p3883_p11 = scmp.lt.s32.totalorder %s4062_s27, %s3881_s16 }
  0x23   : > { %p3878_p2 = pnand %p3876_p0, %p3862_p1  ;;  %p3884_p4 = scmp.lt.s32.totalorder %s3882_s20, %s3875_s13 }
  0x25   : > { %p3879_p12 = pneg %p3878_p2  ;;  %p3885_p5 = por %p3884_p4, %p3883_p11 }
  0x27   : > { %p3886_p7 = pnand %p3885_p5, %p3879_p12 }
  0x29   : > { %3889 = shalt.err (!%p3886_p7)
}
  0x2a   : > { %s3959_s21 = smov 128   ;;  %s3960_s22 = smov 8  }
  0x2b   : > { %3800 = dma.hbm_to_vmem [thread:$0]  (!%p4058_p13), %s4054_s25, 1024, %s4062_s27, %s4064_s29, %s3959_s21, %s3959_s21, %s3960_s22  }
  0x2c   : > { %p3783_p9 = scmp.ge.s32.totalorder %s3956_s9, 1  ;;  %p106_p1 = scmp.lt.s32.totalorder %s3956_s9, 3 }
  0x2e   : > { %p107_p3 = pnand %p3783_p9, %p106_p1 }
  0x30   : > { %110 = sbr.rel (%p107_p3) target bundleno = 914 (0x392), region = 24 }
  0x37   : > { %s4095_s23 = sand.u32 1, %s3948_s7  }
  0x38   : > { %s3784_s24 = sshll.u32 %s4095_s23, 6  ;;  %s113_s26 = scalar_lea.sflag [#allocation3], %s4095_s23 }
  0x39   : > { %s4101_s30 = scalar_lea.vmem [#allocation2], %s3784_s24 }
  0x3a   : > { %3935 = dma.done.wait (%p4034_p6), %s113_s26, 1024  }
  0x3b   : > { %3937 = vsyncadd (%p4034_p6), %s113_s26, 4294966272  ;;  %v145_v0 = vlaneseq  ;;  %v137_v4 = vld [vmem:[%s4101_s30] sm:$0xff]  ;;  %v138_v19 = vld [vmem:[%s4101_s30 + $0x8] sm:$0xff]  ;;  %v3961_v47 = vmov 1983009808   ;;  %s3963_s17 = smov 2  }
  0x3c   : > { %v139_v28 = vld [vmem:[%s4101_s30 + $0x10] sm:$0xff]  ;;  %v140_v37 = vld [vmem:[%s4101_s30 + $0x18] sm:$0xff]  ;;  %v852_v48 = vunpack.c.l.s4 %v3961_v47  ;;  %v141_v52 = vld [vmem:[%s4101_s30 + $0x20] sm:$0xff]  ;;  %s3964_s25 = smov 4   ;;  %s3965_s27 = smov 6   ;;  %vm3505_vm0 = vcmask 15360  }
  0x3d   : > { %v4107_v1 = vshrl.u32 %v145_v0, 7  ;;  %s3966_s28 = smov 8   ;;  %s3967_s29 = smov 10   ;;  %vm3514_vm1 = vcmask 31744   ;;  %vm3523_vm2 = vcmask 48128   ;;  %vm3532_vm3 = vcmask 64512  }
  0x3e   : > { %v853_v53 = vunpack.c.0.s8 %v852_v48  ;;  %v142_v48 = vld [vmem:[%s4101_s30 + $0x28] sm:$0xff]  ;;  %s3968_s2 = smov 12   ;;  %s3969_s3 = smov 14   ;;  %vm3541_vm4 = vcmask 80896   ;;  %vm3550_vm5 = vcmask 97280   ;;  %vm3559_vm6 = vcmask 113664  }
  0x3f   : > { %v4110_v2 = vsub.s32 1, %v4107_v1  ;;  %v4113_v3 = vsub.s32 0, %v4107_v1  ;;  %v4119_v7 = vsub.s32 2, %v4107_v1  ;;  %v4123_v9 = vsub.s32 3, %v4107_v1  ;;  %s3970_s4 = smov 16   ;;  %s3971_s5 = smov 18  }
  0x40   : > { %v4127_v11 = vsub.s32 4, %v4107_v1  ;;  %v4131_v13 = vsub.s32 5, %v4107_v1  ;;  %v4135_v15 = vsub.s32 6, %v4107_v1  ;;  %v4139_v17 = vsub.s32 7, %v4107_v1  ;;  %s3972_s11 = smov 20   ;;  %s3973_s13 = smov 22  }
  0x41   : > { %v159_v5 = vrot.slane %v137_v4, %v4110_v2  ;;  %v148_v6 = vrot.slane %v137_v4, %v4113_v3  ;;  %v170_v8 = vrot.slane %v137_v4, %v4119_v7  ;;  %v181_v10 = vrot.slane %v137_v4, %v4123_v9  ;;  %s3974_s14 = smov 24   ;;  %s3975_s16 = smov 26  }
  0x42   : > { %v192_v12 = vrot.slane %v137_v4, %v4127_v11  ;;  %v203_v14 = vrot.slane %v137_v4, %v4131_v13  ;;  %v214_v16 = vrot.slane %v137_v4, %v4135_v15  ;;  %v225_v18 = vrot.slane %v137_v4, %v4139_v17  ;;  %s3976_s20 = smov 28   ;;  %s3977_s21 = smov 30  }
  0x43   : > { %161 = vbcast.lane.b32.xlu1 %v159_v5, 256  ;;  %150 = vbcast.lane.b32.xlu0 %v148_v6, 256  ;;  %v236_v20 = vrot.slane %v138_v19, %v4113_v3  ;;  %v247_v21 = vrot.slane %v138_v19, %v4110_v2  ;;  %v258_v22 = vrot.slane %v138_v19, %v4119_v7  ;;  %vm3568_vm7 = vcmask 130048   ;;  %s6203_s22 = scalar_lea.vmem [#allocation5], %s3784_s24  ;;  %s3978_s26 = smov 32  }
  0x44   : > { %v269_v23 = vrot.slane %v138_v19, %v4123_v9  ;;  %v280_v24 = vrot.slane %v138_v19, %v4127_v11  ;;  %v291_v25 = vrot.slane %v138_v19, %v4131_v13  ;;  %v302_v26 = vrot.slane %v138_v19, %v4135_v15  ;;  %s3792_s24 = sshll.u32 %s4012_s10, 10  ;;  %p6741_p11 = scmp.ne.s32.totalorder %s6452_s18, 0 }
  0x45   : > { %v313_v27 = vrot.slane %v138_v19, %v4139_v17  ;;  %v324_v29 = vrot.slane %v139_v28, %v4113_v3  ;;  %v335_v30 = vrot.slane %v139_v28, %v4110_v2  ;;  %v346_v31 = vrot.slane %v139_v28, %v4119_v7  ;;  %s3979_s10 = smov [#allocation5]  }
  0x46   : > { %v357_v32 = vrot.slane %v139_v28, %v4123_v9  ;;  %v368_v33 = vrot.slane %v139_v28, %v4127_v11  ;;  %v379_v34 = vrot.slane %v139_v28, %v4131_v13  ;;  %v390_v35 = vrot.slane %v139_v28, %v4135_v15 }
  0x47   : > { %165 = vbcast.lane.b32.xlu1 %v159_v5, 264  ;;  %154 = vbcast.lane.b32.xlu0 %v148_v6, 264  ;;  %v401_v36 = vrot.slane %v139_v28, %v4139_v17  ;;  %v412_v38 = vrot.slane %v140_v37, %v4113_v3  ;;  %v423_v39 = vrot.slane %v140_v37, %v4110_v2  ;;  %vm3577_vm8 = vcmask 146432  }
  0x48   : > { %v434_v40 = vrot.slane %v140_v37, %v4119_v7  ;;  %v445_v41 = vrot.slane %v140_v37, %v4123_v9  ;;  %v456_v42 = vrot.slane %v140_v37, %v4127_v11  ;;  %v467_v43 = vrot.slane %v140_v37, %v4131_v13 }
  0x49   : > { %v478_v46 = vrot.slane %v140_v37, %v4135_v15  ;;  %v489_v51 = vrot.slane %v140_v37, %v4139_v17  ;;  %v500_v56 = vrot.slane %v141_v52, %v4113_v3  ;;  %v4184_v57 = vsub.s32 %v853_v53, %v4107_v1 }
  0x4a   : > { %v511_v62 = vrot.slane %v141_v52, %v4110_v2  ;;  %vm3586_vm9 = vcmask 162816   ;;  %vm3595_vm10 = vcmask 179200   ;;  %vm3604_vm11 = vcmask 195584  }
  0x4b   : > { %176 = vbcast.lane.b32.xlu1 %v170_v8, 264  ;;  %172 = vbcast.lane.b32.xlu0 %v170_v8, 256  ;;  %v522_v8 = vrot.slane %v141_v52, %v4119_v7  ;;  %vm3613_vm12 = vcmask 211968   ;;  %vm3622_vm13 = vcmask 228352   ;;  %vm3631_vm14 = vcmask 244736  }
  0x4c   : > { %vm3640_vm15 = vcmask 261120  }
  0x4f   : > { %187 = vbcast.lane.b32.xlu1 %v181_v10, 264  ;;  %183 = vbcast.lane.b32.xlu0 %v181_v10, 256 }
  0x53   : > { %198 = vbcast.lane.b32.xlu1 %v192_v12, 264  ;;  %194 = vbcast.lane.b32.xlu0 %v192_v12, 256 }
  0x57   : > { %209 = vbcast.lane.b32.xlu1 %v203_v14, 264  ;;  %205 = vbcast.lane.b32.xlu0 %v203_v14, 256  ;;  %v533_v14 = vrot.slane %v141_v52, %v4123_v9 }
  0x5b   : > { %220 = vbcast.lane.b32.xlu1 %v214_v16, 264  ;;  %216 = vbcast.lane.b32.xlu0 %v214_v16, 256  ;;  %v3962_v16 = vmov 1934713408  }
  0x5f   : > { %231 = vbcast.lane.b32.xlu1 %v225_v18, 264  ;;  %227 = vbcast.lane.b32.xlu0 %v225_v18, 256  ;;  %v916_v18 = vunpack.c.l.s4 %v3962_v16  ;;  %v610_v16 = vrot.slane %v142_v48, %v4119_v7 }
  0x63   : > { %242 = vbcast.lane.b32.xlu1 %v236_v20, 264  ;;  %238 = vbcast.lane.b32.xlu0 %v236_v20, 256 }
  0x67   : > { %253 = vbcast.lane.b32.xlu1 %v247_v21, 264  ;;  %249 = vbcast.lane.b32.xlu0 %v247_v21, 256  ;;  %v544_v21 = vrot.slane %v141_v52, %v4127_v11 }
  0x6b   : > { %264 = vbcast.lane.b32.xlu1 %v258_v22, 264  ;;  %260 = vbcast.lane.b32.xlu0 %v258_v22, 256  ;;  %v917_v22 = vunpack.c.0.s8 %v916_v18 }
  0x6f   : > { %275 = vbcast.lane.b32.xlu1 %v269_v23, 264  ;;  %271 = vbcast.lane.b32.xlu0 %v269_v23, 256 }
  0x73   : > { %286 = vbcast.lane.b32.xlu1 %v280_v24, 264  ;;  %282 = vbcast.lane.b32.xlu0 %v280_v24, 256 }
  0x77   : > { %297 = vbcast.lane.b32.xlu1 %v291_v25, 264  ;;  %293 = vbcast.lane.b32.xlu0 %v291_v25, 256 }
  0x7b   : > { %308 = vbcast.lane.b32.xlu1 %v302_v26, 264  ;;  %304 = vbcast.lane.b32.xlu0 %v302_v26, 256 }
  0x7f   : > { %319 = vbcast.lane.b32.xlu1 %v313_v27, 264  ;;  %315 = vbcast.lane.b32.xlu0 %v313_v27, 256  ;;  %v555_v27 = vrot.slane %v141_v52, %v4131_v13 }
  0x83   : > { %330 = vbcast.lane.b32.xlu1 %v324_v29, 264  ;;  %326 = vbcast.lane.b32.xlu0 %v324_v29, 256  ;;  %v4223_v29 = vsub.s32 %v917_v22, %v4107_v1  ;;  %v621_v22 = vrot.slane %v142_v48, %v4123_v9 }
  0x87   : > { %341 = vbcast.lane.b32.xlu1 %v335_v30, 264  ;;  %337 = vbcast.lane.b32.xlu0 %v335_v30, 256 }
  0x8b   : > { %352 = vbcast.lane.b32.xlu1 %v346_v31, 264  ;;  %348 = vbcast.lane.b32.xlu0 %v346_v31, 256 }
  0x8f   : > { %363 = vbcast.lane.b32.xlu1 %v357_v32, 264  ;;  %359 = vbcast.lane.b32.xlu0 %v357_v32, 256 }
  0x93   : > { %374 = vbcast.lane.b32.xlu1 %v368_v33, 264  ;;  %370 = vbcast.lane.b32.xlu0 %v368_v33, 256 }
  0x97   : > { %385 = vbcast.lane.b32.xlu1 %v379_v34, 264  ;;  %381 = vbcast.lane.b32.xlu0 %v379_v34, 256 }
  0x9b   : > { %396 = vbcast.lane.b32.xlu1 %v390_v35, 264  ;;  %392 = vbcast.lane.b32.xlu0 %v390_v35, 256 }
  0x9f   : > { %407 = vbcast.lane.b32.xlu1 %v401_v36, 264  ;;  %403 = vbcast.lane.b32.xlu0 %v401_v36, 256  ;;  %v566_v36 = vrot.slane %v141_v52, %v4135_v15 }
  0xa3   : > { %418 = vbcast.lane.b32.xlu1 %v412_v38, 264  ;;  %414 = vbcast.lane.b32.xlu0 %v412_v38, 256 }
  0xa7   : > { %429 = vbcast.lane.b32.xlu1 %v423_v39, 264  ;;  %425 = vbcast.lane.b32.xlu0 %v423_v39, 256 }
  0xab   : > { %440 = vbcast.lane.b32.xlu1 %v434_v40, 264  ;;  %436 = vbcast.lane.b32.xlu0 %v434_v40, 256 }
  0xaf   : > { %451 = vbcast.lane.b32.xlu1 %v445_v41, 264  ;;  %447 = vbcast.lane.b32.xlu0 %v445_v41, 256 }
  0xb3   : > { %462 = vbcast.lane.b32.xlu1 %v456_v42, 264  ;;  %458 = vbcast.lane.b32.xlu0 %v456_v42, 256  ;;  %v577_v42 = vrot.slane %v141_v52, %v4139_v17 }
  0xb5   : > { %v4167_v44 = vpop.permute.xlu1 %161  ;;  %v4169_v45 = vpop.permute.xlu0 %150 }
  0xb7   : > { %473 = vbcast.lane.b32.xlu1 %v467_v43, 264  ;;  %469 = vbcast.lane.b32.xlu0 %v467_v43, 256 }
  0xb9   : > { %v4172_v49 = vpop.permute.xlu1 %165  ;;  %v4174_v50 = vpop.permute.xlu0 %154 }
  0xba   : > { %6455 = vst [vmem:[#allocation8_spill] sm:$0xff] %v4172_v49  ;;  %6456 = vst [vmem:[#allocation9_spill] sm:$0xff] %v4174_v50 }
  0xbb   : > { %484 = vbcast.lane.b32.xlu1 %v478_v46, 264  ;;  %480 = vbcast.lane.b32.xlu0 %v478_v46, 256 }
  0xbd   : > { %v4178_v54 = vpop.permute.xlu1 %176  ;;  %v4180_v55 = vpop.permute.xlu0 %172 }
  0xbe   : > { %6457 = vst [vmem:[#allocation10_spill] sm:$0xff] %v4178_v54  ;;  %v849_v58 = vcombine.low %v4169_v45, %v4180_v55 }
  0xbf   : > { %495 = vbcast.lane.b32.xlu1 %v489_v51, 264  ;;  %491 = vbcast.lane.b32.xlu0 %v489_v51, 256 }
  0xc0   : > { %v857_v0 = vrot.slane %v849_v58, %v4184_v57 }
  0xc1   : > { %v4188_v59 = vpop.permute.xlu1 %187  ;;  %v4190_v60 = vpop.permute.xlu0 %183 }
  0xc2   : > { %6458 = vst [vmem:[#allocation11_spill] sm:$0xff] %v4188_v59  ;;  %v865_v61 = vcombine.low %v4167_v44, %v4190_v60 }
  0xc3   : > { %506 = vbcast.lane.b32.xlu1 %v500_v56, 264  ;;  %502 = vbcast.lane.b32.xlu0 %v500_v56, 256  ;;  %v588_v56 = vrot.slane %v142_v48, %v4113_v3 }
  0xc4   : > { %v873_v63 = vrot.slane %v865_v61, %v4184_v57 }
  0xc5   : > { %v4197_v4 = vpop.permute.xlu1 %198  ;;  %v4199_v5 = vpop.permute.xlu0 %194 }
  0xc6   : > { %6459 = vst [vmem:[#allocation12_spill] sm:$0xff] %v4197_v4  ;;  %v914_v6 = vcombine.high %v857_v0, %v873_v63  ;;  %v913_v30 = vcombine.low %v857_v0, %v873_v63  ;;  %v599_v63 = vrot.slane %v142_v48, %v4110_v2 }
  0xc7   : > { %517 = vbcast.lane.b32.xlu1 %v511_v62, 264  ;;  %513 = vbcast.lane.b32.xlu0 %v511_v62, 256 }
  0xc8   : > { %v4236_v1 = vrot.slane %v913_v30, %v4223_v29  ;;  %v4242_v40 = vrot.slane %v914_v6, %v4223_v29 }
  0xc9   : > { %v4202_v10 = vpop.permute.xlu1 %209  ;;  %v4204_v12 = vpop.permute.xlu0 %205 }
  0xca   : > { %6460 = vst [vmem:[#allocation13_spill] sm:$0xff] %v4202_v10  ;;  %6467 = vst [vmem:[#allocation20_spill] sm:$0xff] %v4236_v1 }
  0xcb   : > { %528 = vbcast.lane.b32.xlu1 %v522_v8, 264  ;;  %524 = vbcast.lane.b32.xlu0 %v522_v8, 256 }
  0xcd   : > { %v4207_v19 = vpop.permute.xlu1 %220  ;;  %v4209_v20 = vpop.permute.xlu0 %216 }
  0xce   : > { %6461 = vst [vmem:[#allocation14_spill] sm:$0xff] %v4207_v19  ;;  %v881_v23 = vcombine.low %v4199_v5, %v4209_v20 }
  0xcf   : > { %539 = vbcast.lane.b32.xlu1 %v533_v14, 264  ;;  %535 = vbcast.lane.b32.xlu0 %v533_v14, 256 }
  0xd0   : > { %v889_v31 = vrot.slane %v881_v23, %v4184_v57 }
  0xd1   : > { %v4214_v24 = vpop.permute.xlu1 %231  ;;  %v4216_v25 = vpop.permute.xlu0 %227 }
  0xd2   : > { %6462 = vst [vmem:[#allocation15_spill] sm:$0xff] %v4214_v24  ;;  %v897_v26 = vcombine.low %v4204_v12, %v4216_v25 }
  0xd3   : > { %550 = vbcast.lane.b32.xlu1 %v544_v21, 264  ;;  %546 = vbcast.lane.b32.xlu0 %v544_v21, 256 }
  0xd4   : > { %v905_v28 = vrot.slane %v897_v26, %v4184_v57 }
  0xd5   : > { %v4226_v32 = vpop.permute.xlu1 %242  ;;  %v4228_v33 = vpop.permute.xlu0 %238 }
  0xd6   : > { %6463 = vst [vmem:[#allocation16_spill] sm:$0xff] %v4226_v32  ;;  %6464 = vst [vmem:[#allocation17_spill] sm:$0xff] %v4228_v33  ;;  %v945_v34 = vcombine.low %v889_v31, %v905_v28  ;;  %v946_v35 = vcombine.high %v889_v31, %v905_v28 }
  0xd7   : > { %561 = vbcast.lane.b32.xlu1 %v555_v27, 264  ;;  %557 = vbcast.lane.b32.xlu0 %v555_v27, 256  ;;  %v632_v27 = vrot.slane %v142_v48, %v4127_v11 }
  0xd8   : > { %v4239_v39 = vrot.slane %v945_v34, %v4223_v29  ;;  %v4245_v41 = vrot.slane %v946_v35, %v4223_v29  ;;  %v643_v34 = vrot.slane %v142_v48, %v4131_v13 }
  0xd9   : > { %v4231_v37 = vpop.permute.xlu1 %253  ;;  %v4233_v38 = vpop.permute.xlu0 %249 }
  0xda   : > { %6465 = vst [vmem:[#allocation18_spill] sm:$0xff] %v4231_v37  ;;  %6466 = vst [vmem:[#allocation19_spill] sm:$0xff] %v4233_v38 }
  0xdb   : > { %6468 = vst [vmem:[#allocation21_spill] sm:$0xff] %v4239_v39  ;;  %572 = vbcast.lane.b32.xlu1 %v566_v36, 264  ;;  %568 = vbcast.lane.b32.xlu0 %v566_v36, 256 }
  0xdd   : > { %v4255_v51 = vpop.permute.xlu1 %264  ;;  %v4257_v53 = vpop.permute.xlu0 %260 }
  0xde   : > { %6469 = vst [vmem:[#allocation22_spill] sm:$0xff] %v4255_v51  ;;  %6470 = vst [vmem:[#allocation23_spill] sm:$0xff] %v4257_v53  ;;  %v985_v52 = vcombine.low %v4228_v33, %v4257_v53 }
  0xdf   : > { %583 = vbcast.lane.b32.xlu1 %v577_v42, 264  ;;  %579 = vbcast.lane.b32.xlu0 %v577_v42, 256 }
  0xe0   : > { %v993_v6 = vrot.slane %v985_v52, %v4184_v57 }
  0xe1   : > { %v4262_v58 = vpop.permute.xlu0 %271  ;;  %v4264_v61 = vpop.permute.xlu1 %275 }
  0xe2   : > { %6471 = vst [vmem:[#allocation24_spill] sm:$0xff] %v4262_v58  ;;  %6472 = vst [vmem:[#allocation25_spill] sm:$0xff] %v4264_v61  ;;  %v1001_v62 = vcombine.low %v4233_v38, %v4262_v58 }
  0xe3   : > { %594 = vbcast.lane.b32.xlu1 %v588_v56, 264  ;;  %590 = vbcast.lane.b32.xlu0 %v588_v56, 256 }
  0xe4   : > { %v1009_v0 = vrot.slane %v1001_v62, %v4184_v57 }
  0xe5   : > { %v4271_v8 = vpop.permute.xlu0 %282  ;;  %v4274_v18 = vpop.permute.xlu1 %286 }
  0xe6   : > { %6473 = vst [vmem:[#allocation26_spill] sm:$0xff] %v4271_v8  ;;  %v1050_v14 = vcombine.high %v993_v6, %v1009_v0  ;;  %6474 = vst [vmem:[#allocation27_spill] sm:$0xff] %v4274_v18  ;;  %v1049_v42 = vcombine.low %v993_v6, %v1009_v0 }
  0xe7   : > { %605 = vbcast.lane.b32.xlu1 %v599_v63, 264  ;;  %601 = vbcast.lane.b32.xlu0 %v599_v63, 256 }
  0xe8   : > { %v4301_v47 = vrot.slane %v1049_v42, %v4223_v29  ;;  %v4307_v0 = vrot.slane %v1050_v14, %v4223_v29  ;;  %v143_v14 = vld [vmem:[%s4101_s30 + $0x30] sm:$0xff] }
  0xe9   : > { %v4276_v21 = vpop.permute.xlu0 %293  ;;  %v4281_v26 = vpop.permute.xlu1 %297  ;;  %v731_v51 = vrot.slane %v143_v14, %v4131_v13 }
  0xea   : > { %6475 = vst [vmem:[#allocation28_spill] sm:$0xff] %v4276_v21  ;;  %6477 = vst [vmem:[#allocation30_spill] sm:$0xff] %v4281_v26 }
  0xeb   : > { %616 = vbcast.lane.b32.xlu1 %v610_v16, 264  ;;  %612 = vbcast.lane.b32.xlu0 %v610_v16, 256  ;;  %v654_v16 = vrot.slane %v142_v48, %v4135_v15  ;;  %6479 = vst [vmem:[#allocation32_spill] sm:$0xff] %v4301_v47 }
  0xed   : > { %v4279_v23 = vpop.permute.xlu0 %304  ;;  %v4291_v35 = vpop.permute.xlu1 %308 }
  0xee   : > { %6476 = vst [vmem:[#allocation29_spill] sm:$0xff] %v4279_v23  ;;  %v1017_v28 = vcombine.low %v4271_v8, %v4279_v23  ;;  %6478 = vst [vmem:[#allocation31_spill] sm:$0xff] %v4291_v35  ;;  %v709_v35 = vrot.slane %v143_v14, %v4123_v9 }
  0xef   : > { %627 = vbcast.lane.b32.xlu1 %v621_v22, 264  ;;  %623 = vbcast.lane.b32.xlu0 %v621_v22, 256 }
  0xf0   : > { %v1025_v56 = vrot.slane %v1017_v28, %v4184_v57  ;;  %v665_v28 = vrot.slane %v142_v48, %v4139_v17 }
  0xf1   : > { %v4286_v30 = vpop.permute.xlu0 %315 }
  0xf2   : > { %v1033_v31 = vcombine.low %v4276_v21, %v4286_v30 }
  0xf3   : > { %638 = vbcast.lane.b32.xlu1 %v632_v27, 264  ;;  %634 = vbcast.lane.b32.xlu0 %v632_v27, 256  ;;  %v4312_v27 = vpop.permute.xlu1 %319 }
  0xf4   : > { %v1041_v36 = vrot.slane %v1033_v31, %v4184_v57  ;;  %6481 = vst [vmem:[#allocation34_spill] sm:$0xff] %v4312_v27  ;;  %v698_v27 = vrot.slane %v143_v14, %v4119_v7 }
  0xf5   : > { %v4295_v52 = vpop.permute.xlu0 %326 }
  0xf6   : > { %v1081_v62 = vcombine.low %v1025_v56, %v1041_v36  ;;  %v1082_v63 = vcombine.high %v1025_v56, %v1041_v36 }
  0xf7   : > { %649 = vbcast.lane.b32.xlu1 %v643_v34, 264  ;;  %645 = vbcast.lane.b32.xlu0 %v643_v34, 256 }
  0xf8   : > { %v4304_v31 = vrot.slane %v1081_v62, %v4223_v29  ;;  %v4310_v6 = vrot.slane %v1082_v63, %v4223_v29  ;;  %v676_v62 = vrot.slane %v143_v14, %v4113_v3  ;;  %v4325_v63 = vpop.permute.xlu1 %330 }
  0xf9   : > { %v4298_v22 = vpop.permute.xlu0 %337  ;;  %6482 = vst [vmem:[#allocation35_spill] sm:$0xff] %v4325_v63 }
  0xfa   : > { %6480 = vst [vmem:[#allocation33_spill] sm:$0xff] %v4304_v31 }
  0xfb   : > { %660 = vbcast.lane.b32.xlu1 %v654_v16, 264  ;;  %656 = vbcast.lane.b32.xlu0 %v654_v16, 256  ;;  %v687_v16 = vrot.slane %v143_v14, %v4110_v2 }
  0xfc   : > { %v4338_v26 = vpop.permute.xlu1 %341 }
  0xfd   : > { %v4322_v56 = vpop.permute.xlu0 %348  ;;  %6483 = vst [vmem:[#allocation36_spill] sm:$0xff] %v4338_v26 }
  0xfe   : > { %v1121_v48 = vcombine.low %v4295_v52, %v4322_v56 }
  0xff   : > { %671 = vbcast.lane.b32.xlu1 %v665_v28, 264  ;;  %667 = vbcast.lane.b32.xlu0 %v665_v28, 256 }
 0x100   : > { %v1129_v46 = vrot.slane %v1121_v48, %v4184_v57  ;;  %v4344_v37 = vpop.permute.xlu1 %352 }
 0x101   : > { %v4329_v34 = vpop.permute.xlu0 %359  ;;  %6484 = vst [vmem:[#allocation37_spill] sm:$0xff] %v4344_v37 }
 0x102   : > { %v1137_v36 = vcombine.low %v4298_v22, %v4329_v34 }
 0x103   : > { %682 = vbcast.lane.b32.xlu1 %v676_v62, 264  ;;  %678 = vbcast.lane.b32.xlu0 %v676_v62, 256  ;;  %v720_v62 = vrot.slane %v143_v14, %v4127_v11 }
 0x104   : > { %v1145_v42 = vrot.slane %v1137_v36, %v4184_v57 }
 0x105   : > { %v4336_v43 = vpop.permute.xlu0 %370 }
 0x106   : > { %v1186_v28 = vcombine.high %v1129_v46, %v1145_v42  ;;  %v1185_v26 = vcombine.low %v1129_v46, %v1145_v42 }
 0x107   : > { %693 = vbcast.lane.b32.xlu1 %v687_v16, 264  ;;  %689 = vbcast.lane.b32.xlu0 %v687_v16, 256  ;;  %v4353_v16 = vpop.permute.xlu1 %363 }
 0x108   : > { %6485 = vst [vmem:[#allocation38_spill] sm:$0xff] %v4353_v16  ;;  %v742_v16 = vrot.slane %v143_v14, %v4135_v15  ;;  %v4368_v24 = vrot.slane %v1185_v26, %v4223_v29  ;;  %v4374_v46 = vrot.slane %v1186_v28, %v4223_v29 }
 0x109   : > { %v4341_v18 = vpop.permute.xlu0 %381 }
 0x10a   : > { %6489 = vst [vmem:[#allocation42_spill] sm:$0xff] %v4368_v24 }
 0x10b   : > { %704 = vbcast.lane.b32.xlu1 %v698_v27, 264  ;;  %700 = vbcast.lane.b32.xlu0 %v698_v27, 256  ;;  %v4363_v54 = vpop.permute.xlu1 %374 }
 0x10c   : > { %6487 = vst [vmem:[#allocation40_spill] sm:$0xff] %v4363_v54 }
 0x10d   : > { %v4346_v36 = vpop.permute.xlu0 %392 }
 0x10e   : > { %v1153_v48 = vcombine.low %v4336_v43, %v4346_v36 }
 0x10f   : > { %715 = vbcast.lane.b32.xlu1 %v709_v35, 264  ;;  %711 = vbcast.lane.b32.xlu0 %v709_v35, 256  ;;  %v4389_v28 = vpop.permute.xlu1 %385 }
 0x110   : > { %v1161_v63 = vrot.slane %v1153_v48, %v4184_v57  ;;  %6492 = vst [vmem:[#allocation45_spill] sm:$0xff] %v4389_v28 }
 0x111   : > { %v4351_v61 = vpop.permute.xlu0 %403 }
 0x112   : > { %v1169_v32 = vcombine.low %v4341_v18, %v4351_v61 }
 0x113   : > { %726 = vbcast.lane.b32.xlu1 %v720_v62, 264  ;;  %722 = vbcast.lane.b32.xlu0 %v720_v62, 256  ;;  %v4399_v26 = vpop.permute.xlu1 %396 }
 0x114   : > { %v1177_v27 = vrot.slane %v1169_v32, %v4184_v57  ;;  %6494 = vst [vmem:[#allocation47_spill] sm:$0xff] %v4399_v26 }
 0x115   : > { %v4360_v35 = vpop.permute.xlu0 %414 }
 0x116   : > { %6486 = vst [vmem:[#allocation39_spill] sm:$0xff] %v4360_v35  ;;  %v1217_v37 = vcombine.low %v1161_v63, %v1177_v27  ;;  %v1218_v50 = vcombine.high %v1161_v63, %v1177_v27  ;;  %v753_v63 = vrot.slane %v143_v14, %v4139_v17 }
 0x117   : > { %737 = vbcast.lane.b32.xlu1 %v731_v51, 264  ;;  %733 = vbcast.lane.b32.xlu0 %v731_v51, 256  ;;  %v4408_v19 = vpop.permute.xlu1 %407 }
 0x118   : > { %v4371_v32 = vrot.slane %v1217_v37, %v4223_v29  ;;  %v4377_v42 = vrot.slane %v1218_v50, %v4223_v29  ;;  %v144_v37 = vld [vmem:[%s4101_s30 + $0x38] sm:$0xff]  ;;  %6497 = vst [vmem:[#allocation50_spill] sm:$0xff] %v4408_v19  ;;  %s3704_s30 = sshll.u32 %s6203_s22, 4  ;;  %s6296_s30 = int_to_ptr.vmem [resolvable:$true] %s3704_s30 }
 0x119   : > { %v4365_v10 = vpop.permute.xlu0 %425  ;;  %v764_v50 = vrot.slane %v144_v37, %v4113_v3  ;;  %v786_v54 = vrot.slane %v144_v37, %v4119_v7 }
 0x11a   : > { %6488 = vst [vmem:[#allocation41_spill] sm:$0xff] %v4365_v10  ;;  %6490 = vst [vmem:[#allocation43_spill] sm:$0xff] %v4371_v32 }
 0x11b   : > { %748 = vbcast.lane.b32.xlu1 %v742_v16, 264  ;;  %744 = vbcast.lane.b32.xlu0 %v742_v16, 256  ;;  %v775_v16 = vrot.slane %v144_v37, %v4110_v2  ;;  %v797_v2 = vrot.slane %v144_v37, %v4123_v9  ;;  %v819_v9 = vrot.slane %v144_v37, %v4131_v13 }
 0x11d   : > { %v4387_v48 = vpop.permute.xlu0 %436 }
 0x11e   : > { %6491 = vst [vmem:[#allocation44_spill] sm:$0xff] %v4387_v48  ;;  %v1257_v14 = vcombine.low %v4360_v35, %v4387_v48  ;;  %v830_v35 = vrot.slane %v144_v37, %v4135_v15 }
 0x11f   : > { %759 = vbcast.lane.b32.xlu1 %v753_v63, 264  ;;  %755 = vbcast.lane.b32.xlu0 %v753_v63, 256 }
 0x120   : > { %v1265_v28 = vrot.slane %v1257_v14, %v4184_v57 }
 0x121   : > { %v4394_v27 = vpop.permute.xlu0 %447 }
 0x122   : > { %6493 = vst [vmem:[#allocation46_spill] sm:$0xff] %v4394_v27  ;;  %v1273_v62 = vcombine.low %v4365_v10, %v4394_v27 }
 0x123   : > { %770 = vbcast.lane.b32.xlu1 %v764_v50, 264  ;;  %766 = vbcast.lane.b32.xlu0 %v764_v50, 256  ;;  %v4414_v50 = vpop.permute.xlu1 %418 }
 0x124   : > { %v1281_v51 = vrot.slane %v1273_v62, %v4184_v57  ;;  %v808_v62 = vrot.slane %v144_v37, %v4127_v11  ;;  %6499 = vst [vmem:[#allocation52_spill] sm:$0xff] %v4414_v50 }
 0x125   : > { %v4403_v3 = vpop.permute.xlu0 %458 }
 0x126   : > { %6495 = vst [vmem:[#allocation48_spill] sm:$0xff] %v4403_v3  ;;  %v1322_v63 = vcombine.high %v1265_v28, %v1281_v51  ;;  %v1321_v19 = vcombine.low %v1265_v28, %v1281_v51 }
 0x127   : > { %781 = vbcast.lane.b32.xlu1 %v775_v16, 264  ;;  %777 = vbcast.lane.b32.xlu0 %v775_v16, 256 }
 0x128   : > { %v4431_v48 = vrot.slane %v1321_v19, %v4223_v29  ;;  %v4437_v51 = vrot.slane %v1322_v63, %v4223_v29  ;;  %v1250_v19 = vcombine.high %v4368_v24, %v4371_v32 }
 0x129   : > { %v4406_v4 = vpop.permute.xlu0 %469 }
 0x12a   : > { %6496 = vst [vmem:[#allocation49_spill] sm:$0xff] %v4406_v4  ;;  %6502 = vst [vmem:[#allocation55_spill] sm:$0xff] %v4431_v48 }
 0x12b   : > { %792 = vbcast.lane.b32.xlu1 %v786_v54, 264  ;;  %788 = vbcast.lane.b32.xlu0 %v786_v54, 256 }
 0x12d   : > { %v4411_v26 = vpop.permute.xlu0 %480 }
 0x12e   : > { %6498 = vst [vmem:[#allocation51_spill] sm:$0xff] %v4411_v26  ;;  %v1289_v7 = vcombine.low %v4403_v3, %v4411_v26 }
 0x12f   : > { %803 = vbcast.lane.b32.xlu1 %v797_v2, 264  ;;  %799 = vbcast.lane.b32.xlu0 %v797_v2, 256  ;;  %v4427_v2 = vpop.permute.xlu1 %429 }
 0x130   : > { %v1297_v11 = vrot.slane %v1289_v7, %v4184_v57  ;;  %6501 = vst [vmem:[#allocation54_spill] sm:$0xff] %v4427_v2  ;;  %v841_v7 = vrot.slane %v144_v37, %v4139_v17  ;;  %v1114_v17 = vcombine.high %v4301_v47, %v4304_v31 }
 0x131   : > { %v4418_v14 = vpop.permute.xlu0 %491 }
 0x132   : > { %6500 = vst [vmem:[#allocation53_spill] sm:$0xff] %v4418_v14  ;;  %v1305_v16 = vcombine.low %v4406_v4, %v4418_v14 }
 0x133   : > { %814 = vbcast.lane.b32.xlu1 %v808_v62, 264  ;;  %810 = vbcast.lane.b32.xlu0 %v808_v62, 256 }
 0x134   : > { %v1313_v54 = vrot.slane %v1305_v16, %v4184_v57  ;;  %v4451_v16 = vpop.permute.xlu1 %440 }
 0x135   : > { %v4425_v49 = vpop.permute.xlu0 %502  ;;  %6504 = vst [vmem:[#allocation57_spill] sm:$0xff] %v4451_v16 }
 0x136   : > { %v1353_v50 = vcombine.low %v1297_v11, %v1313_v54  ;;  %v1354_v59 = vcombine.high %v1297_v11, %v1313_v54  ;;  %v978_v54 = vcombine.high %v4236_v1, %v4239_v39 }
 0x137   : > { %825 = vbcast.lane.b32.xlu1 %v819_v9, 264  ;;  %821 = vbcast.lane.b32.xlu0 %v819_v9, 256 }
 0x138   : > { %v4434_v13 = vrot.slane %v1353_v50, %v4223_v29  ;;  %v4440_v28 = vrot.slane %v1354_v59, %v4223_v29  ;;  %v4459_v37 = vpop.permute.xlu1 %451 }
 0x139   : > { %v4442_v62 = vpop.permute.xlu0 %513  ;;  %6505 = vst [vmem:[#allocation58_spill] sm:$0xff] %v4459_v37 }
 0x13a   : > { %6503 = vst [vmem:[#allocation56_spill] sm:$0xff] %v4434_v13  ;;  %v1386_v15 = vcombine.high %v4431_v48, %v4434_v13 }
 0x13b   : > { %836 = vbcast.lane.b32.xlu1 %v830_v35, 264  ;;  %832 = vbcast.lane.b32.xlu0 %v830_v35, 256 }
 0x13c   : > { %v4478_v47 = vpop.permute.xlu1 %462 }
 0x13d   : > { %v4453_v63 = vpop.permute.xlu0 %524  ;;  %6506 = vst [vmem:[#allocation59_spill] sm:$0xff] %v4478_v47 }
 0x13e   : > { %v1393_v59 = vcombine.low %v4425_v49, %v4453_v63 }
 0x13f   : > { %847 = vbcast.lane.b32.xlu1 %v841_v7, 264  ;;  %843 = vbcast.lane.b32.xlu0 %v841_v7, 256 }
 0x140   : > { %v1401_v11 = vrot.slane %v1393_v59, %v4184_v57  ;;  %v4483_v59 = vpop.permute.xlu1 %473 }
 0x141   : > { %v4461_v9 = vpop.permute.xlu0 %535  ;;  %6507 = vst [vmem:[#allocation60_spill] sm:$0xff] %v4483_v59 }
 0x142   : > { %v1409_v35 = vcombine.low %v4442_v62, %v4461_v9 }
 0x143   : > { %3035 = vrot.lane.b32.xlu1 %v1114_v17, %s3963_s17  ;;  %3033 = vrot.lane.b32.xlu0 %v978_v54, %s3963_s17 }
 0x144   : > { %v1417_v7 = vrot.slane %v1409_v35, %v4184_v57  ;;  %v4493_v32 = vpop.permute.xlu1 %484 }
 0x145   : > { %v4473_v50 = vpop.permute.xlu0 %546  ;;  %6508 = vst [vmem:[#allocation61_spill] sm:$0xff] %v4493_v32 }
 0x146   : > { %v1458_v31 = vcombine.high %v1401_v11, %v1417_v7 }
 0x147   : > { %3039 = vrot.lane.b32.xlu1 %v1386_v15, %s3963_s17  ;;  %3037 = vrot.lane.b32.xlu0 %v1250_v19, %s3963_s17  ;;  %v1457_v15 = vcombine.low %v1401_v11, %v1417_v7 }
 0x148   : > { %v4506_v37 = vrot.slane %v1458_v31, %v4223_v29  ;;  %v4511_v11 = vpop.permute.xlu1 %495 }
 0x149   : > { %v4481_v17 = vpop.permute.xlu0 %557  ;;  %v4500_v47 = vrot.slane %v1457_v15, %v4223_v29  ;;  %6512 = vst [vmem:[#allocation65_spill] sm:$0xff] %v4511_v11 }
 0x14b   : > { %6510 = vst [vmem:[#allocation63_spill] sm:$0xff] %v4500_v47 }
 0x14d   : > { %v4485_v54 = vpop.permute.xlu0 %568 }
 0x14e   : > { %v1425_v35 = vcombine.low %v4473_v50, %v4485_v54 }
 0x150   : > { %v1433_v24 = vrot.slane %v1425_v35, %v4184_v57  ;;  %v4526_v35 = vpop.permute.xlu1 %506 }
 0x151   : > { %v4489_v13 = vpop.permute.xlu0 %579  ;;  %6515 = vst [vmem:[#allocation68_spill] sm:$0xff] %v4526_v35 }
 0x152   : > { %v1441_v48 = vcombine.low %v4481_v17, %v4489_v13 }
 0x154   : > { %v1449_v19 = vrot.slane %v1441_v48, %v4184_v57  ;;  %v4536_v16 = vpop.permute.xlu1 %517 }
 0x155   : > { %v4497_v39 = vpop.permute.xlu0 %590  ;;  %6517 = vst [vmem:[#allocation70_spill] sm:$0xff] %v4536_v16 }
 0x156   : > { %6509 = vst [vmem:[#allocation62_spill] sm:$0xff] %v4497_v39  ;;  %v1489_v1 = vcombine.low %v1433_v24, %v1449_v19  ;;  %v1490_v59 = vcombine.high %v1433_v24, %v1449_v19 }
 0x158   : > { %v4503_v2 = vrot.slane %v1489_v1, %v4223_v29  ;;  %v4509_v32 = vrot.slane %v1490_v59, %v4223_v29 }
 0x159   : > { %v4513_v7 = vpop.permute.xlu0 %601 }
 0x15a   : > { %6511 = vst [vmem:[#allocation64_spill] sm:$0xff] %v4503_v2  ;;  %6513 = vst [vmem:[#allocation66_spill] sm:$0xff] %v4513_v7  ;;  %v1522_v48 = vcombine.high %v4500_v47, %v4503_v2  ;;  %v4542_v47 = vpop.permute.xlu1 %528 }
 0x15b   : > { %6520 = vst [vmem:[#allocation73_spill] sm:$0xff] %v4542_v47 }
 0x15c   : > { %3041 = vrot.lane.b32.xlu0 %v1522_v48, %s3963_s17 }
 0x15d   : > { %v4524_v59 = vpop.permute.xlu0 %612 }
 0x15e   : > { %6514 = vst [vmem:[#allocation67_spill] sm:$0xff] %v4524_v59  ;;  %v1529_v15 = vcombine.low %v4497_v39, %v4524_v59  ;;  %v4548_v59 = vpop.permute.xlu1 %539 }
 0x15f   : > { %6522 = vst [vmem:[#allocation75_spill] sm:$0xff] %v4548_v59 }
 0x160   : > { %v1537_v11 = vrot.slane %v1529_v15, %v4184_v57 }
 0x161   : > { %v4530_v19 = vpop.permute.xlu0 %623 }
 0x162   : > { %6516 = vst [vmem:[#allocation69_spill] sm:$0xff] %v4530_v19  ;;  %v1545_v24 = vcombine.low %v4513_v7, %v4530_v19  ;;  %v4558_v10 = vpop.permute.xlu1 %550 }
 0x163   : > { %6524 = vst [vmem:[#allocation77_spill] sm:$0xff] %v4558_v10 }
 0x164   : > { %v1553_v1 = vrot.slane %v1545_v24, %v4184_v57 }
 0x165   : > { %v4538_v31 = vpop.permute.xlu0 %634 }
 0x166   : > { %6518 = vst [vmem:[#allocation71_spill] sm:$0xff] %v4538_v31  ;;  %v1594_v48 = vcombine.high %v1537_v11, %v1553_v1  ;;  %v1593_v15 = vcombine.low %v1537_v11, %v1553_v1 }
 0x169   : > { %v4540_v2 = vpop.permute.xlu0 %645 }
 0x16a   : > { %6519 = vst [vmem:[#allocation72_spill] sm:$0xff] %v4540_v2 }
 0x16d   : > { %v4544_v35 = vpop.permute.xlu0 %656 }
 0x16e   : > { %6521 = vst [vmem:[#allocation74_spill] sm:$0xff] %v4544_v35  ;;  %v1561_v39 = vcombine.low %v4538_v31, %v4544_v35  ;;  %v4561_v31 = vrot.slane %v1593_v15, %v4223_v29  ;;  %v4567_v35 = vrot.slane %v1594_v48, %v4223_v29  ;;  %v4583_v48 = vpop.permute.xlu1 %561 }
 0x16f   : > { %6527 = vst [vmem:[#allocation80_spill] sm:$0xff] %v4583_v48 }
 0x170   : > { %v1569_v16 = vrot.slane %v1561_v39, %v4184_v57  ;;  %6525 = vst [vmem:[#allocation78_spill] sm:$0xff] %v4561_v31 }
 0x171   : > { %v4550_v7 = vpop.permute.xlu0 %667 }
 0x172   : > { %6523 = vst [vmem:[#allocation76_spill] sm:$0xff] %v4550_v7  ;;  %v1577_v24 = vcombine.low %v4540_v2, %v4550_v7  ;;  %v4589_v15 = vpop.permute.xlu1 %572 }
 0x173   : > { %6528 = vst [vmem:[#allocation81_spill] sm:$0xff] %v4589_v15 }
 0x174   : > { %v1585_v19 = vrot.slane %v1577_v24, %v4184_v57 }
 0x175   : > { %v4556_v3 = vpop.permute.xlu0 %678 }
 0x176   : > { %v1625_v47 = vcombine.low %v1569_v16, %v1585_v19  ;;  %v1626_v26 = vcombine.high %v1569_v16, %v1585_v19  ;;  %v4593_v2 = vpop.permute.xlu1 %583 }
 0x177   : > { %6529 = vst [vmem:[#allocation82_spill] sm:$0xff] %v4593_v2 }
 0x178   : > { %v4564_v59 = vrot.slane %v1625_v47, %v4223_v29  ;;  %v4570_v11 = vrot.slane %v1626_v26, %v4223_v29 }
 0x179   : > { %v4572_v39 = vpop.permute.xlu0 %689 }
 0x17a   : > { %6526 = vst [vmem:[#allocation79_spill] sm:$0xff] %v4564_v59  ;;  %v1658_v1 = vcombine.high %v4561_v31, %v4564_v59  ;;  %v4603_v59 = vpop.permute.xlu1 %594 }
 0x17b   : > { %6530 = vst [vmem:[#allocation83_spill] sm:$0xff] %v4603_v59 }
 0x17c   : > { %3043 = vrot.lane.b32.xlu1 %v1658_v1, %s3963_s17 }
 0x17d   : > { %v4585_v26 = vpop.permute.xlu0 %700 }
 0x17e   : > { %v1665_v1 = vcombine.low %v4556_v3, %v4585_v26  ;;  %v4615_v33 = vpop.permute.xlu1 %605 }
 0x17f   : > { %6531 = vst [vmem:[#allocation84_spill] sm:$0xff] %v4615_v33 }
 0x180   : > { %v1673_v2 = vrot.slane %v1665_v1, %v4184_v57 }
 0x181   : > { %v4587_v24 = vpop.permute.xlu0 %711 }
 0x182   : > { %v1681_v19 = vcombine.low %v4572_v39, %v4587_v24  ;;  %v4629_v8 = vpop.permute.xlu1 %616 }
 0x183   : > { %6534 = vst [vmem:[#allocation87_spill] sm:$0xff] %v4629_v8  ;;  %v850_v8 = vcombine.high %v4169_v45, %v4180_v55 }
 0x184   : > { %v1689_v31 = vrot.slane %v1681_v19, %v4184_v57 }
 0x185   : > { %v4591_v10 = vpop.permute.xlu0 %722 }
 0x186   : > { %v1729_v27 = vcombine.low %v1673_v2, %v1689_v31  ;;  %v1730_v21 = vcombine.high %v1673_v2, %v1689_v31 }
 0x188   : > { %v4620_v53 = vrot.slane %v1729_v27, %v4223_v29  ;;  %v6535_v27 = vcombine.low %v4242_v40, %v4245_v41 }
 0x189   : > { %v4595_v16 = vpop.permute.xlu0 %733 }
 0x18a   : > { %6532 = vst [vmem:[#allocation85_spill] sm:$0xff] %v4620_v53 }
 0x18d   : > { %v4599_v47 = vpop.permute.xlu0 %744 }
 0x18e   : > { %v1697_v48 = vcombine.low %v4591_v10, %v4599_v47 }
 0x190   : > { %v1705_v4 = vrot.slane %v1697_v48, %v4184_v57 }
 0x191   : > { %v4608_v15 = vpop.permute.xlu0 %755 }
 0x192   : > { %v1713_v7 = vcombine.low %v4595_v16, %v4608_v15 }
 0x194   : > { %v1721_v14 = vrot.slane %v1713_v7, %v4184_v57  ;;  %v6537_v7 = vcombine.low %v4374_v46, %v4377_v42 }
 0x195   : > { %v4617_v59 = vpop.permute.xlu0 %766 }
 0x196   : > { %v1761_v19 = vcombine.low %v1705_v4, %v1721_v14  ;;  %v1762_v23 = vcombine.high %v1705_v4, %v1721_v14 }
 0x198   : > { %v4623_v38 = vrot.slane %v1761_v19, %v4223_v29  ;;  %v4640_v19 = vpop.permute.xlu1 %627 }
 0x199   : > { %v4625_v1 = vpop.permute.xlu0 %777  ;;  %6536 = vst [vmem:[#allocation88_spill] sm:$0xff] %v4640_v19  ;;  %v1744_v19 = vrot.slane %v1730_v21, %v4223_v29 }
 0x19a   : > { %6533 = vst [vmem:[#allocation86_spill] sm:$0xff] %v4623_v38  ;;  %v1794_v58 = vcombine.high %v4620_v53, %v4623_v38  ;;  %v1776_v38 = vrot.slane %v1762_v23, %v4223_v29  ;;  %v898_v23 = vcombine.high %v4204_v12, %v4216_v25 }
 0x19c   : > { %3045 = vrot.lane.b32.xlu0 %v1794_v58, %s3963_s17  ;;  %v4651_v53 = vpop.permute.xlu1 %638  ;;  %v1795_v14 = vcombine.low %v1744_v19, %v1776_v38 }
 0x19d   : > { %v4634_v48 = vpop.permute.xlu0 %788  ;;  %6538 = vst [vmem:[#allocation89_spill] sm:$0xff] %v4651_v53  ;;  %v882_v53 = vcombine.high %v4199_v5, %v4209_v20  ;;  %v1170_v5 = vcombine.high %v4341_v18, %v4351_v61  ;;  %v1154_v61 = vcombine.high %v4336_v43, %v4346_v36  ;;  %v1442_v36 = vcombine.high %v4481_v17, %v4489_v13 }
 0x19e   : > { %v1801_v21 = vcombine.low %v4617_v59, %v4634_v48 }
 0x1a0   : > { %3065 = vrot.lane.b32.xlu0 %v6535_v27, %s3964_s25  ;;  %v6539_v27 = vcombine.low %v4506_v37, %v4509_v32  ;;  %v4665_v31 = vpop.permute.xlu1 %649  ;;  %v4697_v55 = vrot.slane %v1801_v21, %v4184_v57 }
 0x1a1   : > { %v4642_v33 = vpop.permute.xlu0 %799  ;;  %6540 = vst [vmem:[#allocation90_spill] sm:$0xff] %v4665_v31 }
 0x1a2   : > { %v1817_v2 = vcombine.low %v4625_v1, %v4642_v33 }
 0x1a4   : > { %3069 = vrot.lane.b32.xlu0 %v6537_v7, %s3964_s25  ;;  %v4708_v18 = vpop.permute.xlu1 %660 }
 0x1a5   : > { %v4648_v58 = vpop.permute.xlu0 %810  ;;  %6542 = vst [vmem:[#allocation91_spill] sm:$0xff] %v4708_v18 }
 0x1a8   : > { %3073 = vrot.lane.b32.xlu0 %v6539_v27, %s3964_s25  ;;  %v866_v27 = vcombine.high %v4167_v44, %v4190_v60  ;;  %v6541_v44 = vcombine.high %v4242_v40, %v4245_v41  ;;  %v4687_v60 = vrot.slane %v898_v23, %v4184_v57  ;;  %v4702_v40 = vrot.slane %v882_v53, %v4184_v57 }
 0x1a9   : > { %v4658_v4 = vpop.permute.xlu0 %821  ;;  %v1138_v41 = vcombine.high %v4298_v22, %v4329_v34  ;;  %v6543_v53 = vcombine.high %v4374_v46, %v4377_v42  ;;  %v1122_v22 = vcombine.high %v4295_v52, %v4322_v56  ;;  %v4736_v46 = vrot.slane %v1154_v61, %v4184_v57 }
 0x1aa   : > { %v4694_v45 = vrot.slane %v866_v27, %v4184_v57  ;;  %v961_v43 = vcombine.low %v4702_v40, %v4687_v60  ;;  %v1410_v42 = vcombine.high %v4442_v62, %v4461_v9  ;;  %v1426_v52 = vcombine.high %v4473_v50, %v4485_v54  ;;  %v4759_v9 = vpop.permute.xlu1 %671 }
 0x1ab   : > { %v6544_v56 = vcombine.high %v4506_v37, %v4509_v32  ;;  %v1394_v50 = vcombine.high %v4425_v49, %v4453_v63  ;;  %6547 = vst [vmem:[#allocation94_spill] sm:$0xff] %v4759_v9  ;;  %v4763_v37 = vrot.slane %v1442_v36, %v4184_v57  ;;  %v1714_v54 = vcombine.high %v4595_v16, %v4608_v15 }
 0x1ac   : > { %3077 = vrot.lane.b32.xlu0 %v1795_v14, %s3964_s25  ;;  %v4678_v14 = vrot.slane %v1817_v2, %v4184_v57  ;;  %v4711_v2 = vrot.slane %v850_v8, %v4184_v57  ;;  %v4726_v8 = vrot.slane %v1170_v5, %v4184_v57  ;;  %v4753_v5 = vrot.slane %v1122_v22, %v4184_v57 }
 0x1ad   : > { %v4667_v7 = vpop.permute.xlu0 %832  ;;  %v969_v32 = vrot.slane %v961_v43, %v4223_v29  ;;  %v4775_v49 = vrot.slane %v1426_v52, %v4184_v57  ;;  %v4788_v43 = vrot.slane %v1394_v50, %v4184_v57 }
 0x1ae   : > { %v1833_v12 = vcombine.low %v4648_v58, %v4667_v7  ;;  %v1865_v23 = vcombine.low %v4697_v55, %v4678_v14  ;;  %v929_v34 = vcombine.low %v4711_v2, %v4694_v45  ;;  %v1233_v62 = vcombine.low %v4736_v46, %v4726_v8 }
 0x1af   : > { %v1505_v22 = vcombine.low %v4775_v49, %v4763_v37 }
 0x1b0   : > { %3097 = vrot.lane.b32.xlu0 %v6541_v44, %s3965_s27  ;;  %v1841_v27 = vrot.slane %v1833_v12, %v4184_v57  ;;  %v4733_v44 = vrot.slane %v1138_v41, %v4184_v57  ;;  %v4747_v13 = vrot.slane %v1865_v23, %v4223_v29  ;;  %v4772_v23 = vrot.slane %v1410_v42, %v4184_v57 }
 0x1b1   : > { %v4691_v20 = vpop.permute.xlu0 %843  ;;  %v937_v63 = vrot.slane %v929_v34, %v4223_v29 }
 0x1b2   : > { %v1849_v25 = vcombine.low %v4658_v4, %v4691_v20  ;;  %6545 = vst [vmem:[#allocation92_spill] sm:$0xff] %v4747_v13  ;;  %v1201_v61 = vcombine.low %v4753_v5, %v4733_v44  ;;  %v1473_v34 = vcombine.low %v4788_v43, %v4772_v23 }
 0x1b3   : > { %v981_v15 = vcombine.low %v937_v63, %v969_v32 }
 0x1b4   : > { %v1857_v21 = vrot.slane %v1849_v25, %v4184_v57  ;;  %3101 = vrot.lane.b32.xlu0 %v6543_v53, %s3965_s27  ;;  %v1796_v25 = vcombine.high %v1744_v19, %v1776_v38  ;;  %v1682_v53 = vcombine.high %v4572_v39, %v4587_v24  ;;  %v1698_v38 = vcombine.high %v4591_v10, %v4599_v47  ;;  %v4797_v47 = vpop.permute.xlu1 %682 }
 0x1b5   : > { %v1241_v19 = vrot.slane %v1233_v62, %v4223_v29  ;;  %v1666_v39 = vcombine.high %v4556_v3, %v4585_v26  ;;  %v4795_v10 = vrot.slane %v1714_v54, %v4184_v57  ;;  %6548 = vst [vmem:[#allocation95_spill] sm:$0xff] %v4797_v47  ;;  %v1209_v24 = vrot.slane %v1201_v61, %v4223_v29 }
 0x1b6   : > { %v1897_v12 = vcombine.low %v1841_v27, %v1857_v21  ;;  %v4803_v36 = vrot.slane %v1682_v53, %v4184_v57  ;;  %v6549_v3 = vcombine.low %v4307_v0, %v4310_v6  ;;  %v1513_v62 = vrot.slane %v1505_v22, %v4223_v29 }
 0x1b7   : > { %v1253_v26 = vcombine.low %v1209_v24, %v1241_v19  ;;  %v4814_v42 = vrot.slane %v1666_v39, %v4184_v57  ;;  %v1866_v54 = vcombine.high %v4697_v55, %v4678_v14  ;;  %v6552_v14 = vcombine.low %v4567_v35, %v4570_v11 }
 0x1b8   : > { %3105 = vrot.lane.b32.xlu0 %v6544_v56, %s3965_s27  ;;  %v4750_v17 = vrot.slane %v1897_v12, %v4223_v29  ;;  %v4806_v12 = vrot.slane %v1698_v38, %v4184_v57  ;;  %v1898_v56 = vcombine.high %v1841_v27, %v1857_v21  ;;  %v4829_v61 = vpop.permute.xlu1 %693 }
 0x1b9   : > { %v1745_v50 = vcombine.low %v4814_v42, %v4803_v36  ;;  %6551 = vst [vmem:[#allocation96_spill] sm:$0xff] %v4829_v61  ;;  %v1880_v38 = vrot.slane %v1866_v54, %v4223_v29 }
 0x1ba   : > { %6546 = vst [vmem:[#allocation93_spill] sm:$0xff] %v4750_v17  ;;  %v1930_v41 = vcombine.high %v4747_v13, %v4750_v17  ;;  %v1777_v52 = vcombine.low %v4806_v12, %v4795_v10  ;;  %v4835_v53 = vrot.slane %v1898_v56, %v4223_v29 }
 0x1bb   : > { %v1753_v55 = vrot.slane %v1745_v50, %v4223_v29  ;;  %v6557_v50 = vld [vmem:[#allocation24_spill] sm:$0xff] }
 0x1bc   : > { %3109 = vrot.lane.b32.xlu0 %v1796_v25, %s3965_s27  ;;  %3047 = vrot.lane.b32.xlu1 %v1930_v41, %s3963_s17  ;;  %v6550_v25 = vcombine.low %v4437_v51, %v4440_v28  ;;  %v1481_v41 = vrot.slane %v1473_v34, %v4223_v29  ;;  %v4832_v21 = vrot.slane %v1777_v52, %v4223_v29  ;;  %v4846_v39 = vpop.permute.xlu1 %704  ;;  %v6554_v34 = vld [vmem:[#allocation28_spill] sm:$0xff]  ;;  %v6556_v52 = vld [vmem:[#allocation26_spill] sm:$0xff] }
 0x1bd   : > { %v1931_v22 = vcombine.low %v1880_v38, %v4835_v53  ;;  %6553 = vst [vmem:[#allocation97_spill] sm:$0xff] %v4846_v39 }
 0x1be   : > { %v1525_v27 = vcombine.low %v1481_v41, %v1513_v62 }
 0x1c0   : > { %3129 = vrot.lane.b32.xlu0 %v981_v15, %s3966_s28  ;;  %3067 = vrot.lane.b32.xlu1 %v6549_v3, %s3964_s25  ;;  %v1797_v15 = vcombine.low %v1753_v55, %v4832_v21  ;;  %v1034_v3 = vcombine.high %v6554_v34, %v4286_v30  ;;  %v6559_v30 = vcombine.high %v4307_v0, %v4310_v6  ;;  %v6563_v34 = vld [vmem:[#allocation49_spill] sm:$0xff]  ;;  %v6565_v0 = vld [vmem:[#allocation46_spill] sm:$0xff] }
 0x1c1   : > { %v6566_v6 = vld [vmem:[#allocation41_spill] sm:$0xff] }
 0x1c2   : > { %v4859_v16 = vrot.slane %v1034_v3, %v4184_v57  ;;  %v1254_v3 = vcombine.high %v1209_v24, %v1241_v19  ;;  %v6570_v24 = vld [vmem:[#allocation44_spill] sm:$0xff] }
 0x1c4   : > { %3133 = vrot.lane.b32.xlu0 %v1253_v26, %s3966_s28  ;;  %3071 = vrot.lane.b32.xlu1 %v6550_v25, %s3964_s25  ;;  %v6555_v26 = vld [vmem:[#allocation29_spill] sm:$0xff]  ;;  %v982_v25 = vcombine.high %v937_v63, %v969_v32 }
 0x1c5   : > { %v1018_v56 = vcombine.high %v6556_v52, %v6555_v26  ;;  %v6562_v63 = vld [vmem:[#allocation53_spill] sm:$0xff]  ;;  %v4870_v52 = vpop.permute.xlu1 %715 }
 0x1c6   : > { %v1306_v26 = vcombine.high %v6563_v34, %v6562_v63  ;;  %6564 = vst [vmem:[#allocation28_spill] sm:$0xff] %v4870_v52  ;;  %v6572_v34 = vld [vmem:[#allocation76_spill] sm:$0xff] }
 0x1c8   : > { %3137 = vrot.lane.b32.xlu0 %v1525_v27, %s3966_s28  ;;  %3075 = vrot.lane.b32.xlu1 %v6552_v14, %s3964_s25  ;;  %v6558_v27 = vld [vmem:[#allocation19_spill] sm:$0xff]  ;;  %v962_v14 = vcombine.high %v4702_v40, %v4687_v60  ;;  %v930_v60 = vcombine.high %v4711_v2, %v4694_v45  ;;  %v4875_v40 = vrot.slane %v1018_v56, %v4184_v57 }
 0x1c9   : > { %v1002_v54 = vcombine.high %v6558_v27, %v6557_v50  ;;  %v1274_v50 = vcombine.high %v6566_v6, %v6565_v0  ;;  %v6567_v27 = vld [vmem:[#allocation51_spill] sm:$0xff]  ;;  %v6569_v45 = vcombine.high %v4437_v51, %v4440_v28  ;;  %v4900_v63 = vrot.slane %v1306_v26, %v4184_v57  ;;  %v6573_v0 = vld [vmem:[#allocation72_spill] sm:$0xff] }
 0x1ca   : > { %v4892_v2 = vrot.slane %v962_v14, %v4223_v29  ;;  %v6571_v56 = vld [vmem:[#allocation39_spill] sm:$0xff]  ;;  %v1526_v6 = vcombine.high %v1481_v41, %v1513_v62  ;;  %v6579_v41 = vcombine.high %v4567_v35, %v4570_v11  ;;  %v1850_v11 = vcombine.high %v4658_v4, %v4691_v20 }
 0x1cb   : > { %v4910_v28 = vrot.slane %v1274_v50, %v4184_v57  ;;  %v1818_v4 = vcombine.high %v4625_v1, %v4642_v33  ;;  %v1834_v20 = vcombine.high %v4648_v58, %v4667_v7  ;;  %v1802_v7 = vcombine.high %v4617_v59, %v4634_v48 }
 0x1cc   : > { %3141 = vrot.lane.b32.xlu0 %v1797_v15, %s3966_s28  ;;  %3079 = vrot.lane.b32.xlu1 %v1931_v22, %s3964_s25  ;;  %v6560_v15 = vld [vmem:[#allocation23_spill] sm:$0xff]  ;;  %v6561_v22 = vld [vmem:[#allocation17_spill] sm:$0xff] }
 0x1cd   : > { %v986_v32 = vcombine.high %v6561_v22, %v6560_v15  ;;  %v1097_v22 = vcombine.low %v4875_v40, %v4859_v16  ;;  %v5002_v59 = vrot.slane %v1834_v20, %v4184_v57  ;;  %v6586_v20 = vld [vmem:[#allocation14_spill] sm:$0xff] }
 0x1cf   : > { %v4895_v19 = vrot.slane %v986_v32, %v4184_v57  ;;  %v6574_v32 = vld [vmem:[#allocation69_spill] sm:$0xff]  ;;  %v4929_v50 = vrot.slane %v1097_v22, %v4223_v29  ;;  %v1798_v22 = vcombine.high %v1753_v55, %v4832_v21 }
 0x1d0   : > { %3161 = vrot.lane.b32.xlu0 %v982_v25, %s3967_s29  ;;  %3099 = vrot.lane.b32.xlu1 %v6559_v30, %s3965_s27  ;;  %v4878_v25 = vrot.slane %v1002_v54, %v4184_v57  ;;  %v6568_v30 = vld [vmem:[#allocation48_spill] sm:$0xff]  ;;  %v1258_v54 = vcombine.high %v6571_v56, %v6570_v24  ;;  %v6577_v24 = vld [vmem:[#allocation74_spill] sm:$0xff]  ;;  %v6578_v56 = vld [vmem:[#allocation71_spill] sm:$0xff] }
 0x1d1   : > { %v1290_v15 = vcombine.high %v6568_v30, %v6567_v27  ;;  %v4905_v27 = vrot.slane %v930_v60, %v4223_v29  ;;  %v6575_v30 = vld [vmem:[#allocation66_spill] sm:$0xff]  ;;  %v1562_v62 = vcombine.high %v6578_v56, %v6577_v24  ;;  %v1932_v24 = vcombine.high %v1880_v38, %v4835_v53 }
 0x1d2   : > { %v1065_v51 = vcombine.low %v4895_v19, %v4878_v25  ;;  %v1546_v26 = vcombine.high %v6575_v30, %v6574_v32  ;;  %v6581_v32 = vld [vmem:[#allocation62_spill] sm:$0xff] }
 0x1d3   : > { %v4913_v14 = vrot.slane %v1290_v15, %v4184_v57  ;;  %v983_v60 = vcombine.low %v4905_v27, %v4892_v2  ;;  %v1234_v15 = vcombine.high %v4736_v46, %v4726_v8  ;;  %v1202_v8 = vcombine.high %v4753_v5, %v4733_v44 }
 0x1d4   : > { %3165 = vrot.lane.b32.xlu0 %v1254_v3, %s3967_s29  ;;  %3103 = vrot.lane.b32.xlu1 %v6569_v45, %s3965_s27  ;;  %v1578_v3 = vcombine.high %v6573_v0, %v6572_v34  ;;  %v4917_v45 = vpop.permute.xlu1 %726  ;;  %v4934_v34 = vrot.slane %v1258_v54, %v4184_v57  ;;  %v4952_v54 = vrot.slane %v1546_v26, %v4184_v57 }
 0x1d5   : > { %6576 = vst [vmem:[#allocation29_spill] sm:$0xff] %v4917_v45  ;;  %v1369_v0 = vcombine.low %v4913_v14, %v4900_v63  ;;  %v4955_v56 = vrot.slane %v1065_v51, %v4223_v29  ;;  %v1506_v44 = vcombine.high %v4775_v49, %v4763_v37  ;;  %v4973_v53 = vrot.slane %v1234_v15, %v4223_v29 }
 0x1d6   : > { %v4941_v35 = vrot.slane %v1578_v3, %v4184_v57  ;;  %v1337_v46 = vcombine.low %v4934_v34, %v4910_v28  ;;  %v4958_v3 = vrot.slane %v1562_v62, %v4184_v57  ;;  %v4986_v37 = vrot.slane %v1850_v11, %v4184_v57 }
 0x1d7   : > { %v1117_v21 = vcombine.low %v4955_v56, %v4929_v50  ;;  %v4976_v33 = vrot.slane %v1369_v0, %v4223_v29  ;;  %v1474_v49 = vcombine.high %v4788_v43, %v4772_v23  ;;  %v4991_v55 = vrot.slane %v1202_v8, %v4223_v29  ;;  %v6584_v8 = vld [vmem:[#allocation11_spill] sm:$0xff] }
 0x1d8   : > { %3169 = vrot.lane.b32.xlu0 %v1526_v6, %s3967_s29  ;;  %3107 = vrot.lane.b32.xlu1 %v6579_v41, %s3965_s27  ;;  %v6580_v6 = vld [vmem:[#allocation67_spill] sm:$0xff]  ;;  %v4968_v5 = vpop.permute.xlu1 %737  ;;  %v1641_v58 = vcombine.low %v4958_v3, %v4941_v35  ;;  %v4994_v38 = vrot.slane %v1337_v46, %v4223_v29  ;;  %v4999_v26 = vrot.slane %v1818_v4, %v4184_v57  ;;  %v6585_v46 = vld [vmem:[#allocation8_spill] sm:$0xff] }
 0x1d9   : > { %v1530_v30 = vcombine.high %v6581_v32, %v6580_v6  ;;  %6582 = vst [vmem:[#allocation26_spill] sm:$0xff] %v4968_v5  ;;  %v1255_v48 = vcombine.low %v4991_v55, %v4973_v53  ;;  %v5011_v43 = vrot.slane %v1506_v44, %v4223_v29  ;;  %v1778_v62 = vcombine.high %v4806_v12, %v4795_v10  ;;  %v6587_v44 = vld [vmem:[#allocation12_spill] sm:$0xff] }
 0x1da   : > { %v1389_v23 = vcombine.low %v4994_v38, %v4976_v33  ;;  %v5016_v41 = vrot.slane %v1802_v7, %v4184_v57  ;;  %v5021_v15 = vrot.slane %v1641_v58, %v4223_v29  ;;  %v5026_v6 = vrot.slane %v1474_v49, %v4223_v29  ;;  %v6588_v58 = vld [vmem:[#allocation15_spill] sm:$0xff]  ;;  %v6589_v7 = vld [vmem:[#allocation13_spill] sm:$0xff] }
 0x1db   : > { %v4979_v1 = vrot.slane %v1530_v30, %v4184_v57  ;;  %v1746_v32 = vcombine.high %v4814_v42, %v4803_v36  ;;  %v1953_v4 = vcombine.low %v6585_v46, %v6584_v8  ;;  %v1985_v49 = vcombine.low %v6589_v7, %v6588_v58  ;;  %v6596_v46 = vld [vmem:[#allocation36_spill] sm:$0xff] }
 0x1dc   : > { %3173 = vrot.lane.b32.xlu0 %v1798_v22, %s3967_s29  ;;  %3111 = vrot.lane.b32.xlu1 %v1932_v24, %s3965_s27  ;;  %v5023_v0 = vpop.permute.xlu1 %748  ;;  %v1881_v10 = vcombine.low %v5016_v41, %v4999_v26  ;;  %v1527_v30 = vcombine.low %v5026_v6, %v5011_v43  ;;  %v5039_v22 = vrot.slane %v1778_v62, %v4223_v29  ;;  %v6598_v7 = vld [vmem:[#allocation40_spill] sm:$0xff]  ;;  %s6294_s27 = scalar_lea.hbm %s6344_s1, %s3792_s24 }
 0x1dd   : > { %v1609_v51 = vcombine.low %v4979_v1, %v4952_v54  ;;  %6583 = vst [vmem:[#allocation24_spill] sm:$0xff] %v5023_v0  ;;  %v5047_v36 = vrot.slane %v1746_v32, %v4223_v29  ;;  %v984_v13 = vcombine.high %v4905_v27, %v4892_v2 }
 0x1de   : > { %v5050_v42 = vrot.slane %v1881_v10, %v4223_v29  ;;  %v5069_v10 = vrot.slane %v1953_v4, %v4184_v57  ;;  %v6595_v4 = vld [vmem:[#allocation38_spill] sm:$0xff] }
 0x1df   : > { %v1617_v12 = vrot.slane %v1609_v51, %v4223_v29  ;;  %v2225_v8 = vcombine.low %v6596_v46, %v6595_v4  ;;  %v6609_v46 = vld [vmem:[#allocation80_spill] sm:$0xff] }
 0x1e0   : > { %3193 = vrot.lane.b32.xlu0 %v983_v60, %s3968_s2  ;;  %3131 = vrot.lane.b32.xlu1 %v1117_v21, %s3966_s28  ;;  %v1913_v60 = vcombine.low %v5002_v59, %v4986_v37  ;;  %v1969_v21 = vcombine.low %v6587_v44, %v6586_v20  ;;  %v5058_v51 = vpop.permute.xlu1 %759  ;;  %v6600_v44 = vld [vmem:[#allocation45_spill] sm:$0xff] }
 0x1e1   : > { %v1661_v11 = vcombine.low %v1617_v12, %v5021_v15  ;;  %6590 = vst [vmem:[#allocation19_spill] sm:$0xff] %v5058_v51 }
 0x1e2   : > { %v5042_v24 = vrot.slane %v1913_v60, %v4223_v29  ;;  %v1799_v60 = vcombine.low %v5047_v36, %v5039_v22 }
 0x1e4   : > { %3197 = vrot.lane.b32.xlu0 %v1255_v48, %s3968_s2  ;;  %3135 = vrot.lane.b32.xlu1 %v1389_v23, %s3966_s28  ;;  %v6591_v48 = vld [vmem:[#allocation10_spill] sm:$0xff]  ;;  %v6592_v23 = vld [vmem:[#allocation9_spill] sm:$0xff]  ;;  %v1933_v32 = vcombine.low %v5050_v42, %v5042_v24 }
 0x1e5   : > { %v1937_v62 = vcombine.low %v6592_v23, %v6591_v48  ;;  %v6593_v23 = vld [vmem:[#allocation37_spill] sm:$0xff] }
 0x1e7   : > { %v5078_v17 = vrot.slane %v1937_v62, %v4184_v57  ;;  %v5092_v62 = vpop.permute.xlu1 %770 }
 0x1e8   : > { %3201 = vrot.lane.b32.xlu0 %v1527_v30, %s3968_s2  ;;  %3139 = vrot.lane.b32.xlu1 %v1661_v11, %s3966_s28  ;;  %v5072_v30 = vrot.slane %v1969_v21, %v4184_v57  ;;  %v5075_v11 = vrot.slane %v1985_v49, %v4184_v57  ;;  %v6597_v21 = vld [vmem:[#allocation47_spill] sm:$0xff]  ;;  %v6599_v49 = vld [vmem:[#allocation50_spill] sm:$0xff]  ;;  %6601 = vst [vmem:[#allocation23_spill] sm:$0xff] %v5092_v62 }
 0x1e9   : > { %v2241_v58 = vcombine.low %v6598_v7, %v6597_v21  ;;  %v2257_v20 = vcombine.low %v6600_v44, %v6599_v49  ;;  %v2001_v2 = vcombine.low %v5078_v17, %v5069_v10  ;;  %v1256_v44 = vcombine.high %v4991_v55, %v4973_v53  ;;  %v6604_v21 = vld [vmem:[#allocation75_spill] sm:$0xff]  ;;  %v6605_v53 = vld [vmem:[#allocation70_spill] sm:$0xff] }
 0x1ea   : > { %v2033_v27 = vcombine.low %v5072_v30, %v5075_v11  ;;  %v5112_v49 = vrot.slane %v2225_v8, %v4184_v57  ;;  %v2497_v55 = vcombine.low %v6605_v53, %v6604_v21 }
 0x1eb   : > { %v5115_v7 = vrot.slane %v2241_v58, %v4184_v57  ;;  %v5130_v4 = vpop.permute.xlu1 %781 }
 0x1ec   : > { %3205 = vrot.lane.b32.xlu0 %v1799_v60, %s3968_s2  ;;  %3143 = vrot.lane.b32.xlu1 %v1933_v32, %s3966_s28  ;;  %v1118_v60 = vcombine.high %v4955_v56, %v4929_v50  ;;  %v6594_v32 = vld [vmem:[#allocation35_spill] sm:$0xff]  ;;  %v1066_v50 = vcombine.high %v4895_v19, %v4878_v25  ;;  %v1098_v56 = vcombine.high %v4875_v40, %v4859_v16  ;;  %v6602_v19 = vld [vmem:[#allocation73_spill] sm:$0xff]  ;;  %v6603_v16 = vld [vmem:[#allocation68_spill] sm:$0xff] }
 0x1ed   : > { %v2209_v48 = vcombine.low %v6594_v32, %v6593_v23  ;;  %v5118_v25 = vrot.slane %v2257_v20, %v4184_v57  ;;  %v2481_v40 = vcombine.low %v6603_v16, %v6602_v19  ;;  %6610 = vst [vmem:[#allocation17_spill] sm:$0xff] %v5130_v4  ;;  %v1528_v20 = vcombine.high %v5026_v6, %v5011_v43 }
 0x1ee   : > { %v1662_v16 = vcombine.high %v1617_v12, %v5021_v15  ;;  %v5136_v19 = vrot.slane %v2001_v2, %v4223_v29  ;;  %v1370_v43 = vcombine.high %v4913_v14, %v4900_v63  ;;  %v5157_v6 = vrot.slane %v2497_v55, %v4184_v57 }
 0x1ef   : > { %v5154_v15 = vrot.slane %v2481_v40, %v4184_v57  ;;  %v2769_v63 = vcombine.low %v4829_v61, %v4870_v52  ;;  %v2785_v14 = vcombine.low %v4917_v45, %v5023_v0  ;;  %v1338_v40 = vcombine.high %v4934_v34, %v4910_v28  ;;  %v5181_v55 = vpop.permute.xlu1 %792  ;;  %v6621_v45 = vld [vmem:[#allocation27_spill] sm:$0xff] }
 0x1f0   : > { %3225 = vrot.lane.b32.xlu0 %v984_v13, %s3969_s3  ;;  %3163 = vrot.lane.b32.xlu1 %v1118_v60, %s3967_s29  ;;  %v1390_v13 = vcombine.high %v4994_v38, %v4976_v33  ;;  %v5109_v60 = vrot.slane %v2209_v48, %v4184_v57  ;;  %v6606_v33 = vld [vmem:[#allocation81_spill] sm:$0xff]  ;;  %v6608_v48 = vld [vmem:[#allocation82_spill] sm:$0xff]  ;;  %6611 = vst [vmem:[#allocation53_spill] sm:$0xff] %v5181_v55 }
 0x1f1   : > { %v6607_v38 = vld [vmem:[#allocation77_spill] sm:$0xff]  ;;  %v2529_v58 = vcombine.low %v6609_v46, %v6608_v48  ;;  %v5146_v46 = vrot.slane %v1066_v50, %v4223_v29  ;;  %v5149_v48 = vrot.slane %v1098_v56, %v4223_v29  ;;  %v2801_v50 = vcombine.low %v4968_v5, %v5058_v51  ;;  %v6619_v5 = vld [vmem:[#allocation18_spill] sm:$0xff] }
 0x1f2   : > { %v2513_v8 = vcombine.low %v6607_v38, %v6606_v33  ;;  %v2305_v38 = vcombine.low %v5115_v7, %v5118_v25  ;;  %v1800_v56 = vcombine.high %v5047_v36, %v5039_v22  ;;  %v2545_v28 = vcombine.low %v5154_v15, %v5157_v6  ;;  %v6632_v33 = vld [vmem:[#allocation65_spill] sm:$0xff] }
 0x1f3   : > { %v5165_v2 = vrot.slane %v2529_v58, %v4184_v57  ;;  %v1119_v58 = vcombine.low %v5146_v46, %v5149_v48  ;;  %v1642_v36 = vcombine.high %v4958_v3, %v4941_v35  ;;  %v1610_v35 = vcombine.high %v4979_v1, %v4952_v54  ;;  %v5221_v3 = vpop.permute.xlu0 %3033 }
 0x1f4   : > { %3229 = vrot.lane.b32.xlu0 %v1256_v44, %s3969_s3  ;;  %3167 = vrot.lane.b32.xlu1 %v1390_v13, %s3967_s29  ;;  %v5139_v44 = vrot.slane %v2033_v27, %v4223_v29  ;;  %v2273_v13 = vcombine.low %v5109_v60, %v5112_v49  ;;  %v5162_v12 = vrot.slane %v2513_v8, %v4184_v57 }
 0x1f5   : > { %v2753_v27 = vcombine.low %v4797_v47, %v4846_v39  ;;  %6612 = vst [vmem:[#allocation49_spill] sm:$0xff] %v5221_v3  ;;  %v6630_v47 = vld [vmem:[#allocation61_spill] sm:$0xff] }
 0x1f6   : > { %v2065_v8 = vcombine.low %v5136_v19, %v5139_v44  ;;  %v5190_v22 = vrot.slane %v2273_v13, %v4223_v29  ;;  %v2577_v34 = vcombine.low %v5162_v12, %v5165_v2  ;;  %v5208_v13 = vrot.slane %v2769_v63, %v4184_v57 }
 0x1f7   : > { %v5255_v3 = vpop.permute.xlu0 %3037 }
 0x1f8   : > { %3233 = vrot.lane.b32.xlu0 %v1528_v20, %s3969_s3  ;;  %3171 = vrot.lane.b32.xlu1 %v1662_v16, %s3967_s29  ;;  %v1934_v16 = vcombine.high %v5050_v42, %v5042_v24  ;;  %v5193_v24 = vrot.slane %v2305_v38, %v4223_v29  ;;  %v5202_v42 = vrot.slane %v1370_v43, %v4223_v29  ;;  %v5225_v43 = vpop.permute.xlu1 %803 }
 0x1f9   : > { %v5205_v20 = vrot.slane %v2753_v27, %v4184_v57  ;;  %v5211_v38 = vrot.slane %v2785_v14, %v4184_v57  ;;  %6613 = vst [vmem:[#allocation46_spill] sm:$0xff] %v5225_v43  ;;  %v5232_v14 = vrot.slane %v2545_v28, %v4223_v29  ;;  %v5235_v54 = vrot.slane %v2577_v34, %v4223_v29 }
 0x1fa   : > { %v2337_v27 = vcombine.low %v5190_v22, %v5193_v24  ;;  %v5251_v28 = vrot.slane %v1610_v35, %v4223_v29  ;;  %6614 = vst [vmem:[#allocation41_spill] sm:$0xff] %v5255_v3 }
 0x1fb   : > { %v2817_v1 = vcombine.low %v5205_v20, %v5208_v13  ;;  %v2609_v34 = vcombine.low %v5232_v14, %v5235_v54 }
 0x1fc   : > { %3237 = vrot.lane.b32.xlu0 %v1800_v56, %s3969_s3  ;;  %3175 = vrot.lane.b32.xlu1 %v1934_v16, %s3967_s29  ;;  %v5214_v56 = vrot.slane %v2801_v50, %v4184_v57  ;;  %v5217_v16 = vrot.slane %v1338_v40, %v4223_v29  ;;  %v1914_v40 = vcombine.high %v5002_v59, %v4986_v37  ;;  %s3691_s29 = scalar_lea.sflag [#allocation4], %s4095_s23 }
 0x1fd   : > { %v5260_v59 = vrot.slane %v2817_v1, %v4223_v29  ;;  %v6618_v1 = vld [vmem:[#allocation25_spill] sm:$0xff] }
 0x1fe   : > { %v1391_v63 = vcombine.low %v5217_v16, %v5202_v42  ;;  %v2849_v50 = vcombine.low %v5211_v38, %v5214_v56  ;;  %v2089_v51 = vcombine.low %v6619_v5, %v6618_v1 }
 0x200   : > { %3257 = vrot.lane.b32.xlu0 %v2065_v8, %s3970_s4  ;;  %3195 = vrot.lane.b32.xlu1 %v1119_v58, %s3968_s2  ;;  %v5244_v8 = vrot.slane %v1642_v36, %v4223_v29  ;;  %v1882_v58 = vcombine.high %v5016_v41, %v4999_v26  ;;  %v5263_v26 = vrot.slane %v2849_v50, %v4223_v29  ;;  %v5268_v36 = vpop.permute.xlu1 %814  ;;  %v6620_v50 = vld [vmem:[#allocation31_spill] sm:$0xff] }
 0x201   : > { %v5266_v41 = vrot.slane %v1914_v40, %v4223_v29  ;;  %6615 = vst [vmem:[#allocation51_spill] sm:$0xff] %v5268_v36  ;;  %v2105_v0 = vcombine.low %v6621_v45, %v6620_v50  ;;  %v5281_v40 = vpop.permute.xlu0 %3041  ;;  %v2066_v45 = vcombine.high %v5136_v19, %v5139_v44  ;;  %v6628_v44 = vld [vmem:[#allocation58_spill] sm:$0xff] }
 0x202   : > { %v1663_v37 = vcombine.low %v5251_v28, %v5244_v8  ;;  %v5273_v35 = vrot.slane %v1882_v58, %v4223_v29  ;;  %6622 = vst [vmem:[#allocation48_spill] sm:$0xff] %v5281_v40  ;;  %v2881_v61 = vcombine.low %v5260_v59, %v5263_v26  ;;  %v6624_v58 = vld [vmem:[#allocation30_spill] sm:$0xff]  ;;  %v5299_v40 = vrot.slane %v2089_v51, %v4184_v57  ;;  %v6631_v51 = vld [vmem:[#allocation59_spill] sm:$0xff] }
 0x203   : > { %v5302_v5 = vrot.slane %v2105_v0, %v4184_v57  ;;  %v2377_v39 = vcombine.low %v6631_v51, %v6630_v47  ;;  %v6633_v0 = vld [vmem:[#allocation60_spill] sm:$0xff]  ;;  %v2338_v51 = vcombine.high %v5190_v22, %v5193_v24  ;;  %v6635_v22 = vld [vmem:[#allocation87_spill] sm:$0xff] }
 0x204   : > { %3261 = vrot.lane.b32.xlu0 %v2337_v27, %s3970_s4  ;;  %3199 = vrot.lane.b32.xlu1 %v1391_v63, %s3968_s2  ;;  %v6616_v27 = vld [vmem:[#allocation22_spill] sm:$0xff]  ;;  %v6617_v63 = vld [vmem:[#allocation16_spill] sm:$0xff]  ;;  %v2393_v53 = vcombine.low %v6633_v0, %v6632_v33  ;;  %v1392_v0 = vcombine.high %v5217_v16, %v5202_v42  ;;  %v6636_v24 = vld [vmem:[#allocation83_spill] sm:$0xff] }
 0x205   : > { %v2073_v3 = vcombine.low %v6617_v63, %v6616_v27  ;;  %v5291_v63 = vpop.permute.xlu1 %825  ;;  %v2617_v42 = vcombine.low %v6636_v24, %v6635_v22  ;;  %v6637_v16 = vld [vmem:[#allocation88_spill] sm:$0xff]  ;;  %v2610_v24 = vcombine.high %v5232_v14, %v5235_v54  ;;  %v6657_v22 = vld [vmem:[#allocation45_spill] sm:$0xff] }
 0x206   : > { %6625 = vst [vmem:[#allocation44_spill] sm:$0xff] %v5291_v63  ;;  %v6638_v33 = vld [vmem:[#allocation84_spill] sm:$0xff] }
 0x207   : > { %v5296_v50 = vrot.slane %v2073_v3, %v4184_v57  ;;  %v6629_v3 = vld [vmem:[#allocation54_spill] sm:$0xff]  ;;  %v2633_v47 = vcombine.low %v6638_v33, %v6637_v16  ;;  %v1664_v33 = vcombine.high %v5251_v28, %v5244_v8  ;;  %v5386_v8 = vrot.slane %v2617_v42, %v4184_v57 }
 0x208   : > { %3265 = vrot.lane.b32.xlu0 %v2609_v34, %s3970_s4  ;;  %3203 = vrot.lane.b32.xlu1 %v1663_v37, %s3968_s2  ;;  %v1935_v34 = vcombine.low %v5273_v35, %v5266_v41  ;;  %v6623_v37 = vld [vmem:[#allocation34_spill] sm:$0xff]  ;;  %v2361_v27 = vcombine.low %v6629_v3, %v6628_v44 }
 0x209   : > { %v2121_v52 = vcombine.low %v6624_v58, %v6623_v37  ;;  %v6626_v58 = vld [vmem:[#allocation57_spill] sm:$0xff]  ;;  %v6627_v37 = vld [vmem:[#allocation52_spill] sm:$0xff]  ;;  %v5389_v28 = vrot.slane %v2633_v47, %v4184_v57  ;;  %v2905_v47 = vcombine.low %v5130_v4, %v5225_v43  ;;  %v6656_v16 = vld [vmem:[#allocation50_spill] sm:$0xff] }
 0x20a   : > { %v2345_v19 = vcombine.low %v6627_v37, %v6626_v58  ;;  %v2258_v37 = vcombine.high %v6657_v22, %v6656_v16 }
 0x20c   : > { %3269 = vrot.lane.b32.xlu0 %v2881_v61, %s3970_s4  ;;  %3207 = vrot.lane.b32.xlu1 %v1935_v34, %s3968_s2  ;;  %v1120_v61 = vcombine.high %v5146_v46, %v5149_v48  ;;  %v5309_v34 = vrot.slane %v2121_v52, %v4184_v57  ;;  %v2002_v52 = vcombine.high %v5078_v17, %v5069_v10  ;;  %s3890_s2 = scalar_lea.vmem %s6296_s30, 1024 }
 0x20d   : > { %v2034_v46 = vcombine.high %v5072_v30, %v5075_v11  ;;  %v2137_v48 = vcombine.low %v5296_v50, %v5299_v40  ;;  %v5339_v17 = vrot.slane %v2361_v27, %v4184_v57  ;;  %v5342_v10 = vrot.slane %v2377_v39, %v4184_v57  ;;  %v5344_v30 = vpop.permute.xlu1 %836  ;;  %v6639_v27 = vld [vmem:[#allocation89_spill] sm:$0xff]  ;;  %p3891_p6 = scmp.ne.s32.totalorder %s6296_s30, %s3890_s2 }
 0x20e   : > { %v5304_v1 = vpop.permute.xlu0 %3045  ;;  %6634 = vst [vmem:[#allocation39_spill] sm:$0xff] %v5344_v30  ;;  %v5347_v11 = vrot.slane %v2393_v53, %v4184_v57  ;;  %v2665_v39 = vcombine.low %v4665_v31, %v4759_v9  ;;  %v5360_v44 = vrot.slane %v2002_v52, %v4223_v29  ;;  %v2274_v31 = vcombine.high %v5109_v60, %v5112_v49 }
 0x20f   : > { %v2306_v52 = vcombine.high %v5115_v7, %v5118_v25  ;;  %v2889_v60 = vcombine.low %v5092_v62, %v5181_v55  ;;  %v6651_v62 = vld [vmem:[#allocation9_spill] sm:$0xff]  ;;  %v2170_v22 = vcombine.high %v5302_v5, %v5309_v34  ;;  %p3892_p12 = pnand %p3891_p6, %p6741_p11 }
 0x210   : > { %3289 = vrot.lane.b32.xlu0 %v2066_v45, %s3971_s5  ;;  %3227 = vrot.lane.b32.xlu1 %v1120_v61, %s3969_s3  ;;  %v2169_v45 = vcombine.low %v5302_v5, %v5309_v34  ;;  %v5336_v61 = vrot.slane %v2345_v19, %v4184_v57  ;;  %v2649_v19 = vcombine.low %v6639_v27, %v4708_v18  ;;  %v6655_v27 = vld [vmem:[#allocation40_spill] sm:$0xff] }
 0x211   : > { %v2441_v54 = vcombine.low %v5342_v10, %v5347_v11  ;;  %v5397_v49 = vrot.slane %v2665_v39, %v4184_v57  ;;  %v5401_v25 = vpop.permute.xlu1 %847  ;;  %p3893_p13 = pneg %p3892_p12 }
 0x212   : > { %v5327_v3 = vpop.permute.xlu0 %3065  ;;  %v2409_v9 = vcombine.low %v5336_v61, %v5339_v17  ;;  %v5381_v14 = vrot.slane %v2169_v45, %v4223_v29  ;;  %v5394_v7 = vrot.slane %v2649_v19, %v4184_v57  ;;  %6640 = vst [vmem:[#allocation76_spill] sm:$0xff] %v5401_v25  ;;  %v5425_v19 = vrot.slane %v2306_v52, %v4223_v29 }
 0x213   : > { %v5442_v52 = vrot.slane %v2889_v60, %v4184_v57 }
 0x214   : > { %3293 = vrot.lane.b32.xlu0 %v2338_v51, %s3971_s5  ;;  %3231 = vrot.lane.b32.xlu1 %v1392_v0, %s3969_s3  ;;  %v5369_v51 = vrot.slane %v2034_v46, %v4223_v29  ;;  %v5372_v0 = vrot.slane %v2137_v48, %v4223_v29  ;;  %v2882_v46 = vcombine.high %v5260_v59, %v5263_v26 }
 0x215   : > { %v2937_v48 = vcombine.low %v5291_v63, %v5401_v25  ;;  %v5420_v26 = vrot.slane %v2274_v31, %v4223_v29  ;;  %v5428_v39 = vrot.slane %v2409_v9, %v4223_v29  ;;  %v2578_v31 = vcombine.high %v5162_v12, %v5165_v2  ;;  %v5455_v12 = vpop.permute.xlu1 %3035 }
 0x216   : > { %v5362_v53 = vpop.permute.xlu0 %3069  ;;  %v2067_v42 = vcombine.low %v5360_v44, %v5369_v51  ;;  %v2201_v59 = vcombine.low %v5372_v0, %v5381_v14  ;;  %v5445_v9 = vrot.slane %v2905_v47, %v4184_v57  ;;  %6641 = vst [vmem:[#allocation72_spill] sm:$0xff] %v5455_v12 }
 0x217   : > { %v2339_v2 = vcombine.low %v5420_v26, %v5425_v19  ;;  %v2340_v34 = vcombine.high %v5420_v26, %v5425_v19 }
 0x218   : > { %3297 = vrot.lane.b32.xlu0 %v2610_v24, %s3971_s5  ;;  %3235 = vrot.lane.b32.xlu1 %v1664_v33, %s3969_s3  ;;  %v2921_v33 = vcombine.low %v5268_v36, %v5344_v30  ;;  %v1936_v24 = vcombine.high %v5273_v35, %v5266_v41  ;;  %v5431_v41 = vrot.slane %v2441_v54, %v4223_v29  ;;  %v6644_v36 = vld [vmem:[#allocation15_spill] sm:$0xff] }
 0x219   : > { %v2546_v35 = vcombine.high %v5154_v15, %v5157_v6  ;;  %v5451_v15 = vrot.slane %v2937_v48, %v4184_v57  ;;  %v2953_v63 = vcombine.low %v5442_v52, %v5445_v9  ;;  %v5495_v30 = vpop.permute.xlu1 %3039 }
 0x21a   : > { %v5411_v45 = vpop.permute.xlu0 %3073  ;;  %v5448_v54 = vrot.slane %v2921_v33, %v4184_v57  ;;  %v2473_v60 = vcombine.low %v5428_v39, %v5431_v41  ;;  %v5467_v33 = vrot.slane %v2578_v31, %v4223_v29  ;;  %6646 = vst [vmem:[#allocation69_spill] sm:$0xff] %v5495_v30 }
 0x21b   : > { %v5464_v47 = vrot.slane %v2546_v35, %v4223_v29 }
 0x21c   : > { %3301 = vrot.lane.b32.xlu0 %v2882_v46, %s3971_s5  ;;  %3239 = vrot.lane.b32.xlu1 %v1936_v24, %s3969_s3  ;;  %v2681_v46 = vcombine.low %v5386_v8, %v5389_v28  ;;  %v2713_v24 = vcombine.low %v5394_v7, %v5397_v49  ;;  %v2985_v35 = vcombine.low %v5448_v54, %v5451_v15  ;;  %s3894_s3 = sshll.u32 %s3979_s10, 4  ;;  %s3895_s3 = int_to_ptr.vmem [resolvable:$false] %s3894_s3 }
 0x21d   : > { %p3897_p8 = scmp.lt.s32.totalorder %s6296_s30, %s3895_s3 }
 0x21e   : > { %v5453_v6 = vpop.permute.xlu0 %3077  ;;  %v5470_v48 = vrot.slane %v2681_v46, %v4223_v29  ;;  %v5473_v12 = vrot.slane %v2713_v24, %v4223_v29  ;;  %v6642_v46 = vld [vmem:[#allocation14_spill] sm:$0xff]  ;;  %v6643_v24 = vld [vmem:[#allocation12_spill] sm:$0xff] }
 0x21f   : > { %v1970_v25 = vcombine.high %v6643_v24, %v6642_v46  ;;  %v5506_v46 = vrot.slane %v2953_v63, %v4223_v29  ;;  %v6647_v24 = vld [vmem:[#allocation11_spill] sm:$0xff] }
 0x220   : > { %3321 = vrot.lane.b32.xlu0 %v2067_v42, %s3972_s11  ;;  %3259 = vrot.lane.b32.xlu1 %v2201_v59, %s3970_s4  ;;  %v2818_v42 = vcombine.high %v5205_v20, %v5208_v13  ;;  %v2850_v59 = vcombine.high %v5211_v38, %v5214_v56  ;;  %v6645_v20 = vld [vmem:[#allocation13_spill] sm:$0xff]  ;;  %v2611_v38 = vcombine.low %v5464_v47, %v5467_v33 }
 0x221   : > { %v1986_v13 = vcombine.high %v6645_v20, %v6644_v36  ;;  %v2745_v56 = vcombine.low %v5470_v48, %v5473_v12  ;;  %v5509_v36 = vrot.slane %v2985_v35, %v4223_v29  ;;  %v6648_v20 = vld [vmem:[#allocation8_spill] sm:$0xff]  ;;  %v5516_v43 = vrot.slane %v1970_v25, %v4184_v57 }
 0x222   : > { %v5483_v31 = vpop.permute.xlu0 %3097  ;;  %v1954_v30 = vcombine.high %v6648_v20, %v6647_v24  ;;  %v2210_v25 = vcombine.high %v6594_v32, %v6593_v23  ;;  %v6652_v24 = vld [vmem:[#allocation38_spill] sm:$0xff]  ;;  %v6653_v20 = vld [vmem:[#allocation36_spill] sm:$0xff] }
 0x224   : > { %3325 = vrot.lane.b32.xlu0 %v2339_v2, %s3972_s11  ;;  %3263 = vrot.lane.b32.xlu1 %v2473_v60, %s3970_s4  ;;  %v5500_v2 = vrot.slane %v2818_v42, %v4223_v29  ;;  %v5503_v60 = vrot.slane %v2850_v59, %v4223_v29  ;;  %v5519_v42 = vrot.slane %v1986_v13, %v4184_v57  ;;  %v5521_v59 = vpop.permute.xlu1 %3043 }
 0x225   : > { %6649 = vst [vmem:[#allocation66_spill] sm:$0xff] %v5521_v59  ;;  %v2226_v13 = vcombine.high %v6653_v20, %v6652_v24  ;;  %v6654_v59 = vld [vmem:[#allocation47_spill] sm:$0xff]  ;;  %v5542_v58 = vrot.slane %v1954_v30, %v4184_v57  ;;  %v2138_v30 = vcombine.high %v5296_v50, %v5299_v40  ;;  %v5562_v16 = vrot.slane %v2210_v25, %v4184_v57  ;;  %v6662_v24 = vld [vmem:[#allocation81_spill] sm:$0xff] }
 0x226   : > { %v5497_v4 = vpop.permute.xlu0 %3101  ;;  %v2883_v35 = vcombine.low %v5500_v2, %v5503_v60  ;;  %v2242_v18 = vcombine.high %v6655_v27, %v6654_v59  ;;  %v6663_v20 = vld [vmem:[#allocation77_spill] sm:$0xff] }
 0x227   : > { %v5565_v59 = vrot.slane %v2226_v13, %v4184_v57  ;;  %v2514_v13 = vcombine.high %v6663_v20, %v6662_v24  ;;  %v5601_v19 = vrot.slane %v2138_v30, %v4223_v29  ;;  %v2612_v30 = vcombine.high %v5464_v47, %v5467_v33  ;;  %v6667_v33 = vld [vmem:[#allocation97_spill] sm:$0xff]  ;;  %v6671_v20 = vld [vmem:[#allocation24_spill] sm:$0xff] }
 0x228   : > { %3329 = vrot.lane.b32.xlu0 %v2611_v38, %s3972_s11  ;;  %3267 = vrot.lane.b32.xlu1 %v2745_v56, %s3970_s4  ;;  %v3017_v38 = vcombine.low %v5506_v46, %v5509_v36  ;;  %v6650_v56 = vld [vmem:[#allocation10_spill] sm:$0xff] }
 0x229   : > { %v1938_v55 = vcombine.high %v6651_v62, %v6650_v56  ;;  %v2049_v62 = vcombine.low %v5516_v43, %v5519_v42  ;;  %v6661_v56 = vld [vmem:[#allocation70_spill] sm:$0xff]  ;;  %v2289_v26 = vcombine.low %v5562_v16, %v5565_v59 }
 0x22a   : > { %v5523_v63 = vpop.permute.xlu0 %3105  ;;  %v2498_v25 = vcombine.high %v6661_v56, %v6604_v21  ;;  %v6670_v56 = vld [vmem:[#allocation96_spill] sm:$0xff] }
 0x22b   : > { %v5555_v27 = vrot.slane %v1938_v55, %v4184_v57  ;;  %v5570_v55 = vrot.slane %v2242_v18, %v4184_v57  ;;  %v6659_v18 = vld [vmem:[#allocation73_spill] sm:$0xff]  ;;  %v5642_v47 = vrot.slane %v2289_v26, %v4223_v29 }
 0x22c   : > { %3333 = vrot.lane.b32.xlu0 %v2883_v35, %s3972_s11  ;;  %3271 = vrot.lane.b32.xlu1 %v3017_v38, %s3970_s4  ;;  %v2068_v35 = vcombine.high %v5360_v44, %v5369_v51  ;;  %v2202_v38 = vcombine.high %v5372_v0, %v5381_v14  ;;  %v5573_v44 = vrot.slane %v2258_v37, %v4184_v57  ;;  %v6660_v14 = vld [vmem:[#allocation68_spill] sm:$0xff]  ;;  %s3896_s4 = scalar_lea.vmem %s3895_s3, 2048 }
 0x22d   : > { %v2017_v5 = vcombine.low %v5555_v27, %v5542_v58  ;;  %v2474_v51 = vcombine.high %v5428_v39, %v5431_v41  ;;  %v5586_v0 = vrot.slane %v2049_v62, %v4223_v29  ;;  %v2482_v37 = vcombine.high %v6660_v14, %v6659_v18  ;;  %p3898_p10 = scmp.lt.s32.totalorder %s3896_s4, %s3890_s2 }
 0x22e   : > { %v5546_v23 = vpop.permute.xlu1 %3047  ;;  %v5548_v32 = vpop.permute.xlu0 %3109  ;;  %v5604_v39 = vrot.slane %v2170_v22, %v4223_v29  ;;  %v2321_v21 = vcombine.low %v5570_v55, %v5573_v44  ;;  %v2410_v41 = vcombine.high %v5336_v61, %v5339_v17  ;;  %v2442_v62 = vcombine.high %v5342_v10, %v5347_v11 }
 0x22f   : > { %v2746_v22 = vcombine.high %v5470_v48, %v5473_v12  ;;  %v5624_v14 = vrot.slane %v2482_v37, %v4184_v57  ;;  %v5627_v61 = vrot.slane %v2498_v25, %v4184_v57  ;;  %v5630_v17 = vrot.slane %v2514_v13, %v4184_v57  ;;  %v6668_v48 = vld [vmem:[#allocation95_spill] sm:$0xff]  ;;  %v6669_v37 = vld [vmem:[#allocation28_spill] sm:$0xff]  ;;  %v6672_v13 = vld [vmem:[#allocation29_spill] sm:$0xff]  ;;  %p3899_p0 = por %p3898_p10, %p3897_p8 }
 0x230   : > { %3353 = vrot.lane.b32.xlu0 %v2068_v35, %s3973_s13  ;;  %3291 = vrot.lane.b32.xlu1 %v2202_v38, %s3971_s5  ;;  %v6664_v35 = vld [vmem:[#allocation82_spill] sm:$0xff]  ;;  %v6665_v38 = vld [vmem:[#allocation80_spill] sm:$0xff]  ;;  %v2203_v12 = vcombine.low %v5601_v19, %v5604_v39  ;;  %v5649_v25 = vrot.slane %v2321_v21, %v4223_v29  ;;  %v5652_v24 = vrot.slane %v2410_v41, %v4223_v29 }
 0x231   : > { %v3018_v21 = vcombine.high %v5506_v46, %v5509_v36  ;;  %v2561_v41 = vcombine.low %v5624_v14, %v5627_v61  ;;  %p3900_p2 = pnand %p3899_p0, %p3893_p13 }
 0x232   : > { %v5577_v50 = vpop.permute.xlu1 %3067  ;;  %v5579_v40 = vpop.permute.xlu0 %3129 }
 0x233   : > { %6658 = vst [vmem:[#allocation74_spill] sm:$0xff] %v5577_v50  ;;  %v2530_v50 = vcombine.high %v6665_v38, %v6664_v35  ;;  %v2786_v35 = vcombine.high %v6672_v13, %v6671_v20  ;;  %v6673_v38 = vld [vmem:[#allocation19_spill] sm:$0xff]  ;;  %v2714_v20 = vcombine.high %v5394_v7, %v5397_v49 }
 0x234   : > { %3357 = vrot.lane.b32.xlu0 %v2340_v34, %s3973_s13  ;;  %3295 = vrot.lane.b32.xlu1 %v2474_v51, %s3971_s5  ;;  %v5621_v51 = vrot.slane %v2017_v5, %v4223_v29  ;;  %v2754_v5 = vcombine.high %v6668_v48, %v6667_v33  ;;  %v2884_v33 = vcombine.high %v5500_v2, %v5503_v60  ;;  %v6675_v2 = vld [vmem:[#allocation85_spill] sm:$0xff]  ;;  %v6676_v60 = vld [vmem:[#allocation86_spill] sm:$0xff] }
 0x235   : > { %v5633_v10 = vrot.slane %v2530_v50, %v4184_v57  ;;  %v2770_v50 = vcombine.high %v6670_v56, %v6669_v37  ;;  %v5671_v37 = vrot.slane %v2442_v62, %v4223_v29  ;;  %v2682_v56 = vcombine.high %v5386_v8, %v5389_v28 }
 0x236   : > { %v5612_v18 = vpop.permute.xlu1 %3071  ;;  %v5614_v34 = vpop.permute.xlu0 %3133  ;;  %v2069_v11 = vcombine.low %v5621_v51, %v5586_v0  ;;  %v6677_v46 = vcombine.low %v6675_v2, %v6676_v60  ;;  %v5685_v62 = vrot.slane %v2754_v5, %v4184_v57  ;;  %v5693_v28 = vrot.slane %v2786_v35, %v4184_v57 }
 0x237   : > { %6666 = vst [vmem:[#allocation71_spill] sm:$0xff] %v5612_v18  ;;  %v2593_v48 = vcombine.low %v5630_v17, %v5633_v10  ;;  %v5688_v13 = vrot.slane %v2770_v50, %v4184_v57  ;;  %v6679_v50 = vld [vmem:[#allocation20_spill] sm:$0xff]  ;;  %v2341_v35 = vcombine.low %v5642_v47, %v5649_v25  ;;  %v5719_v2 = vrot.slane %v2561_v41, %v4223_v29 }
 0x238   : > { %3361 = vrot.lane.b32.xlu0 %v2612_v30, %s3973_s13  ;;  %3299 = vrot.lane.b32.xlu1 %v2746_v22, %s3971_s5  ;;  %v6674_v30 = vld [vmem:[#allocation26_spill] sm:$0xff]  ;;  %v3512_v36 = vsel %vm3505_vm0, %v6677_v46, %v5304_v1  ;;  %v2954_v41 = vcombine.high %v5442_v52, %v5445_v9  ;;  %v6687_v52 = vld [vmem:[#allocation16_spill] sm:$0xff] }
 0x239   : > { %v2802_v22 = vcombine.high %v6674_v30, %v6673_v38  ;;  %v3521_v8 = vsel %vm3514_vm1, %v3512_v36, %v5453_v6  ;;  %v6678_v38 = vld [vmem:[#allocation49_spill] sm:$0xff]  ;;  %v5722_v60 = vrot.slane %v2593_v48, %v4223_v29  ;;  %v2833_v46 = vcombine.low %v5685_v62, %v5688_v13 }
 0x23a   : > { %v5658_v26 = vpop.permute.xlu1 %3075  ;;  %v5660_v18 = vpop.permute.xlu0 %3137  ;;  %v3530_v7 = vsel %vm3523_vm2, %v3521_v8, %v5548_v32  ;;  %v6680_v30 = vld [vmem:[#allocation21_spill] sm:$0xff]  ;;  %v2986_v48 = vcombine.high %v5448_v54, %v5451_v15  ;;  %v6689_v54 = vld [vmem:[#allocation18_spill] sm:$0xff] }
 0x23b   : > { %v5696_v1 = vrot.slane %v2802_v22, %v4184_v57  ;;  %v2475_v22 = vcombine.low %v5652_v24, %v5671_v37 }
 0x23c   : > { %3365 = vrot.lane.b32.xlu0 %v2884_v33, %s3973_s13  ;;  %3303 = vrot.lane.b32.xlu1 %v3018_v21, %s3971_s5  ;;  %v6681_v33 = vcombine.low %v6679_v50, %v6680_v30 }
 0x23e   : > { %v5700_v49 = vpop.permute.xlu1 %3079  ;;  %v3142_v5 = vpop.permute.xlu0 %3141  ;;  %v3506_v6 = vsel %vm3505_vm0, %v6681_v33, %v6678_v38  ;;  %v6684_v38 = vld [vmem:[#allocation43_spill] sm:$0xff]  ;;  %v6686_v33 = vld [vmem:[#allocation22_spill] sm:$0xff] }
 0x23f   : > { %v5708_v21 = vsel %vm3532_vm3, %v3530_v7, %v3142_v5  ;;  %v3515_v32 = vsel %vm3514_vm1, %v3506_v6, %v5327_v3  ;;  %v5729_v3 = vrot.slane %v2682_v56, %v4223_v29  ;;  %v6682_v56 = vld [vmem:[#allocation41_spill] sm:$0xff]  ;;  %v6683_v5 = vld [vmem:[#allocation42_spill] sm:$0xff]  ;;  %v2074_v9 = vcombine.high %v6687_v52, %v6686_v33  ;;  %v6694_v52 = vld [vmem:[#allocation31_spill] sm:$0xff] }
 0x240   : > { %3385 = vrot.lane.b32.xlu0 %v2069_v11, %s3974_s14  ;;  %3323 = vrot.lane.b32.xlu1 %v2203_v12, %s3972_s11  ;;  %v3524_v36 = vsel %vm3523_vm2, %v3515_v32, %v5483_v31  ;;  %v5732_v11 = vrot.slane %v2714_v20, %v4223_v29  ;;  %v2865_v12 = vcombine.low %v5693_v28, %v5696_v1  ;;  %v6688_v6 = vld [vmem:[#allocation25_spill] sm:$0xff] }
 0x241   : > { %v3533_v8 = vsel %vm3532_vm3, %v3524_v36, %v5579_v40  ;;  %v6685_v20 = vcombine.low %v6683_v5, %v6684_v38  ;;  %v2090_v15 = vcombine.high %v6689_v54, %v6688_v6  ;;  %v2613_v36 = vcombine.low %v5719_v2, %v5722_v60  ;;  %v6690_v38 = vld [vmem:[#allocation48_spill] sm:$0xff]  ;;  %v6695_v6 = vld [vmem:[#allocation27_spill] sm:$0xff] }
 0x242   : > { %v5742_v7 = vpop.permute.xlu1 %3099  ;;  %v3162_v31 = vpop.permute.xlu0 %3161  ;;  %v5780_v5 = vrot.slane %v2986_v48, %v4223_v29  ;;  %v2106_v54 = vcombine.high %v6695_v6, %v6694_v52  ;;  %v5799_v48 = vrot.slane %v2074_v9, %v4184_v57  ;;  %v6699_v52 = vld [vmem:[#allocation52_spill] sm:$0xff] }
 0x243   : > { %v3508_v50 = vsel %vm3505_vm0, %v6685_v20, %v6682_v56  ;;  %v5750_v30 = vsel %vm3541_vm4, %v3533_v8, %v3162_v31  ;;  %v2747_v8 = vcombine.low %v5729_v3, %v5732_v11  ;;  %v5767_v31 = vrot.slane %v2833_v46, %v4223_v29  ;;  %v6691_v20 = vld [vmem:[#allocation63_spill] sm:$0xff] }
 0x244   : > { %v3517_v40 = vsel %vm3514_vm1, %v3508_v50, %v5362_v53  ;;  %3389 = vrot.lane.b32.xlu0 %v2341_v35, %s3974_s14  ;;  %3327 = vrot.lane.b32.xlu1 %v2475_v22, %s3972_s11  ;;  %v5774_v22 = vrot.slane %v2865_v12, %v4223_v29  ;;  %v6692_v50 = vld [vmem:[#allocation64_spill] sm:$0xff]  ;;  %v6696_v12 = vld [vmem:[#allocation34_spill] sm:$0xff] }
 0x245   : > { %v3526_v32 = vsel %vm3523_vm2, %v3517_v40, %v5497_v4  ;;  %v5777_v4 = vrot.slane %v2954_v41, %v4223_v29  ;;  %v6693_v46 = vcombine.low %v6691_v20, %v6692_v50  ;;  %v6697_v40 = vld [vmem:[#allocation30_spill] sm:$0xff] }
 0x246   : > { %v3535_v56 = vsel %vm3532_vm3, %v3526_v32, %v5614_v34  ;;  %v5771_v53 = vpop.permute.xlu1 %3103  ;;  %v3166_v35 = vpop.permute.xlu0 %3165  ;;  %v2122_v32 = vcombine.high %v6697_v40, %v6696_v12  ;;  %v2204_v40 = vcombine.high %v5601_v19, %v5604_v39 }
 0x247   : > { %v3510_v33 = vsel %vm3505_vm0, %v6693_v46, %v6690_v38  ;;  %v5788_v34 = vsel %vm3541_vm4, %v3535_v56, %v3166_v35  ;;  %v5802_v38 = vrot.slane %v2090_v15, %v4184_v57  ;;  %v5818_v15 = vrot.slane %v2106_v54, %v4184_v57 }
 0x248   : > { %v3519_v41 = vsel %vm3514_vm1, %v3510_v33, %v5411_v45  ;;  %3393 = vrot.lane.b32.xlu0 %v2613_v36, %s3974_s14  ;;  %3331 = vrot.lane.b32.xlu1 %v2747_v8, %s3972_s11  ;;  %v2885_v45 = vcombine.low %v5767_v31, %v5774_v22  ;;  %v3019_v36 = vcombine.low %v5777_v4, %v5780_v5  ;;  %v6698_v33 = vld [vmem:[#allocation57_spill] sm:$0xff] }
 0x249   : > { %v3528_v56 = vsel %vm3523_vm2, %v3519_v41, %v5523_v63  ;;  %v5821_v63 = vrot.slane %v2122_v32, %v4184_v57  ;;  %v2050_v8 = vcombine.high %v5516_v43, %v5519_v42  ;;  %v2153_v46 = vcombine.low %v5799_v48, %v5802_v38  ;;  %v6700_v41 = vld [vmem:[#allocation58_spill] sm:$0xff]  ;;  %v6703_v43 = vld [vmem:[#allocation59_spill] sm:$0xff] }
 0x24a   : > { %v3537_v35 = vsel %vm3532_vm3, %v3528_v56, %v5660_v18  ;;  %v5808_v20 = vpop.permute.xlu1 %3107  ;;  %v3170_v50 = vpop.permute.xlu0 %3169  ;;  %v2018_v18 = vcombine.high %v5555_v27, %v5542_v58  ;;  %v2346_v6 = vcombine.high %v6699_v52, %v6698_v33  ;;  %v2070_v32 = vcombine.high %v5621_v51, %v5586_v0  ;;  %v6701_v58 = vld [vmem:[#allocation54_spill] sm:$0xff]  ;;  %v6702_v56 = vld [vmem:[#allocation61_spill] sm:$0xff] }
 0x24b   : > { %v5815_v9 = vsel %vm3541_vm4, %v3537_v35, %v3170_v50  ;;  %v2362_v27 = vcombine.high %v6701_v58, %v6700_v41  ;;  %v2378_v42 = vcombine.high %v6703_v43, %v6702_v56  ;;  %v6704_v35 = vld [vmem:[#allocation65_spill] sm:$0xff]  ;;  %v6705_v50 = vld [vmem:[#allocation60_spill] sm:$0xff]  ;;  %v2185_v33 = vcombine.low %v5818_v15, %v5821_v63  ;;  %v6713_v56 = vld [vmem:[#allocation94_spill] sm:$0xff] }
 0x24c   : > { %3397 = vrot.lane.b32.xlu0 %v2885_v45, %s3974_s14  ;;  %3335 = vrot.lane.b32.xlu1 %v3019_v36, %s3972_s11  ;;  %v2394_v45 = vcombine.high %v6705_v50, %v6704_v35  ;;  %v2290_v0 = vcombine.high %v5562_v16, %v5565_v59  ;;  %v5856_v19 = vrot.slane %v2153_v46, %v4223_v29  ;;  %v6707_v46 = vld [vmem:[#allocation87_spill] sm:$0xff]  ;;  %v6712_v58 = vld [vmem:[#allocation89_spill] sm:$0xff]  ;;  %v6714_v43 = vld [vmem:[#allocation90_spill] sm:$0xff] }
 0x24d   : > { %v5859_v39 = vrot.slane %v2018_v18, %v4223_v29  ;;  %v5862_v51 = vrot.slane %v2050_v8, %v4223_v29  ;;  %v5867_v52 = vrot.slane %v2346_v6, %v4184_v57  ;;  %v2476_v16 = vcombine.high %v5652_v24, %v5671_v37  ;;  %v6708_v6 = vld [vmem:[#allocation83_spill] sm:$0xff]  ;;  %v6709_v24 = vld [vmem:[#allocation88_spill] sm:$0xff] }
 0x24e   : > { %v5833_v54 = vpop.permute.xlu1 %3111  ;;  %v3174_v12 = vpop.permute.xlu0 %3173  ;;  %v2342_v59 = vcombine.high %v5642_v47, %v5649_v25  ;;  %v5876_v18 = vrot.slane %v2362_v27, %v4184_v57  ;;  %v5879_v8 = vrot.slane %v2378_v42, %v4184_v57  ;;  %v6710_v37 = vld [vmem:[#allocation84_spill] sm:$0xff]  ;;  %v5895_v47 = vrot.slane %v2185_v33, %v4223_v29  ;;  %v6711_v25 = vld [vmem:[#allocation91_spill] sm:$0xff] }
 0x24f   : > { %v5847_v36 = vsel %vm3541_vm4, %v5708_v21, %v3174_v12  ;;  %v2322_v21 = vcombine.high %v5570_v55, %v5573_v44  ;;  %v5882_v55 = vrot.slane %v2394_v45, %v4184_v57  ;;  %v2634_v41 = vcombine.high %v6710_v37, %v6709_v24  ;;  %v6717_v37 = vld [vmem:[#allocation46_spill] sm:$0xff] }
 0x250   : > { %3355 = vrot.lane.b32.xlu1 %v2204_v40, %s3973_s13  ;;  %3417 = vrot.lane.b32.xlu0 %v2070_v32, %s3975_s16  ;;  %6706 = vst [vmem:[#allocation67_spill] sm:$0xff] %v5879_v8  ;;  %v2618_v32 = vcombine.high %v6708_v6, %v6707_v46  ;;  %v2650_v27 = vcombine.high %v6712_v58, %v6711_v25  ;;  %v6716_v6 = vld [vmem:[#allocation23_spill] sm:$0xff] }
 0x251   : > { %v2748_v50 = vcombine.high %v5729_v3, %v5732_v11  ;;  %v2614_v45 = vcombine.high %v5719_v2, %v5722_v60  ;;  %v5910_v33 = vrot.slane %v2290_v0, %v4223_v29  ;;  %v5921_v3 = vrot.slane %v2322_v21, %v4223_v29  ;;  %v6715_v21 = vld [vmem:[#allocation53_spill] sm:$0xff]  ;;  %v6719_v58 = vld [vmem:[#allocation39_spill] sm:$0xff] }
 0x252   : > { %v5869_v12 = vpop.permute.xlu1 %3131  ;;  %v3194_v40 = vpop.permute.xlu0 %3193  ;;  %v5924_v2 = vrot.slane %v2618_v32, %v4184_v57  ;;  %v5927_v60 = vrot.slane %v2634_v41, %v4184_v57  ;;  %v2205_v11 = vcombine.low %v5856_v19, %v5895_v47  ;;  %v5934_v0 = vrot.slane %v2650_v27, %v4184_v57  ;;  %v6718_v41 = vld [vmem:[#allocation17_spill] sm:$0xff] }
 0x253   : > { %v5886_v44 = vsel %vm3550_vm5, %v5750_v30, %v3194_v40  ;;  %v2666_v30 = vcombine.high %v6714_v43, %v6713_v56  ;;  %v2071_v40 = vcombine.low %v5859_v39, %v5862_v51  ;;  %v2890_v32 = vcombine.high %v6716_v6, %v6715_v21  ;;  %v6720_v56 = vld [vmem:[#allocation51_spill] sm:$0xff] }
 0x254   : > { %3359 = vrot.lane.b32.xlu1 %v2476_v16, %s3973_s13  ;;  %3421 = vrot.lane.b32.xlu0 %v2342_v59, %s3975_s16  ;;  %v2425_v16 = vcombine.low %v5867_v52, %v5876_v18  ;;  %v2457_v59 = vcombine.low %v5879_v8, %v5882_v55  ;;  %v2886_v24 = vcombine.high %v5767_v31, %v5774_v22 }
 0x255   : > { %v2906_v25 = vcombine.high %v6718_v41, %v6717_v37  ;;  %v2922_v43 = vcombine.high %v6720_v56, %v6719_v58  ;;  %v2343_v6 = vcombine.low %v5910_v33, %v5921_v3  ;;  %v2562_v37 = vcombine.high %v5624_v14, %v5627_v61 }
 0x256   : > { %v5901_v42 = vpop.permute.xlu1 %3135  ;;  %v3198_v35 = vpop.permute.xlu0 %3197  ;;  %v5958_v31 = vrot.slane %v2425_v16, %v4223_v29  ;;  %v5961_v22 = vrot.slane %v2457_v59, %v4223_v29  ;;  %v2594_v41 = vcombine.high %v5630_v17, %v5633_v10  ;;  %v2697_v16 = vcombine.low %v5924_v2, %v5927_v60 }
 0x257   : > { %v5918_v46 = vsel %vm3550_vm5, %v5788_v34, %v3198_v35  ;;  %v5937_v34 = vrot.slane %v2666_v30, %v4184_v57  ;;  %v6721_v35 = vld [vmem:[#allocation76_spill] sm:$0xff]  ;;  %v3020_v30 = vcombine.high %v5777_v4, %v5780_v5  ;;  %v6724_v5 = vld [vmem:[#allocation93_spill] sm:$0xff]  ;;  %v5981_v14 = vrot.slane %v2890_v32, %v4184_v57 }
 0x258   : > { %3363 = vrot.lane.b32.xlu1 %v2748_v50, %s3973_s13  ;;  %3425 = vrot.lane.b32.xlu0 %v2614_v45, %s3975_s16  ;;  %v6722_v50 = vld [vmem:[#allocation44_spill] sm:$0xff]  ;;  %v5986_v17 = vrot.slane %v2906_v25, %v4184_v57 }
 0x259   : > { %v2938_v45 = vcombine.high %v6722_v50, %v6721_v35  ;;  %v6723_v4 = vld [vmem:[#allocation92_spill] sm:$0xff]  ;;  %v2729_v59 = vcombine.low %v5934_v0, %v5937_v34  ;;  %v6728_v50 = vld [vmem:[#allocation33_spill] sm:$0xff] }
 0x25a   : > { %v5949_v27 = vpop.permute.xlu1 %3139  ;;  %v3202_v8 = vpop.permute.xlu0 %3201  ;;  %v6726_v35 = vld [vmem:[#allocation72_spill] sm:$0xff] }
 0x25b   : > { %v5955_v21 = vsel %vm3550_vm5, %v5815_v9, %v3202_v8  ;;  %v6725_v9 = vcombine.low %v6723_v4, %v6724_v5  ;;  %v5992_v10 = vrot.slane %v2938_v45, %v4184_v57  ;;  %v6727_v32 = vld [vmem:[#allocation32_spill] sm:$0xff]  ;;  %v6730_v45 = vld [vmem:[#allocation74_spill] sm:$0xff]  ;;  %v6014_v5 = vrot.slane %v2594_v41, %v4223_v29 }
 0x25c   : > { %3367 = vrot.lane.b32.xlu1 %v3020_v30, %s3973_s13  ;;  %3429 = vrot.lane.b32.xlu0 %v2886_v24, %s3975_s16  ;;  %v6729_v30 = vcombine.low %v6727_v32, %v6728_v50 }
 0x25d   : > { %v3513_v8 = vsel %vm3505_vm0, %v6725_v9, %v5546_v23  ;;  %v5989_v23 = vrot.slane %v2922_v43, %v4184_v57  ;;  %v2477_v57 = vcombine.low %v5958_v31, %v5961_v22 }
 0x25e   : > { %v3522_v61 = vsel %vm3514_vm1, %v3513_v8, %v5700_v49  ;;  %v3144_v58 = vpop.permute.xlu1 %3143  ;;  %v3206_v56 = vpop.permute.xlu0 %3205  ;;  %v3507_v49 = vsel %vm3505_vm0, %v6729_v30, %v6726_v35  ;;  %v6021_v8 = vrot.slane %v2697_v16, %v4223_v29  ;;  %v6732_v16 = vld [vmem:[#allocation55_spill] sm:$0xff] }
 0x25f   : > { %v3531_v24 = vsel %vm3523_vm2, %v3522_v61, %v5833_v54  ;;  %v3557_v43 = vsel %vm3550_vm5, %v5847_v36, %v3206_v56  ;;  %v3516_v4 = vsel %vm3514_vm1, %v3507_v49, %v6730_v45  ;;  %v6011_v54 = vrot.slane %v2562_v37, %v4223_v29  ;;  %v6731_v61 = vld [vmem:[#allocation69_spill] sm:$0xff] }
 0x260   : > { %v3540_v25 = vsel %vm3532_vm3, %v3531_v24, %v3144_v58  ;;  %3387 = vrot.lane.b32.xlu1 %v2205_v11, %s3974_s14  ;;  %3449 = vrot.lane.b32.xlu0 %v2071_v40, %s3976_s20  ;;  %v2834_v36 = vcombine.high %v5685_v62, %v5688_v13  ;;  %v3525_v9 = vsel %vm3523_vm2, %v3516_v4, %v5742_v7  ;;  %v6733_v24 = vld [vmem:[#allocation56_spill] sm:$0xff] }
 0x261   : > { %v6024_v11 = vrot.slane %v2729_v59, %v4223_v29  ;;  %v2866_v40 = vcombine.high %v5693_v28, %v5696_v1  ;;  %v2969_v37 = vcombine.low %v5981_v14, %v5986_v17  ;;  %v3001_v41 = vcombine.low %v5989_v23, %v5992_v10  ;;  %v6735_v1 = vld [vmem:[#allocation71_spill] sm:$0xff] }
 0x262   : > { %v3534_v62 = vsel %vm3532_vm3, %v3525_v9, %v5869_v12  ;;  %v3164_v13 = vpop.permute.xlu1 %3163  ;;  %v3226_v7 = vpop.permute.xlu0 %3225  ;;  %v6734_v58 = vcombine.low %v6732_v16, %v6733_v24  ;;  %v2615_v50 = vcombine.low %v6011_v54, %v6014_v5  ;;  %v2848_v30 = vrot.slane %v2834_v36, %v4223_v29  ;;  %v6737_v9 = vld [vmem:[#allocation78_spill] sm:$0xff] }
 0x263   : > { %v3543_v56 = vsel %vm3541_vm4, %v3534_v62, %v3164_v13  ;;  %v3560_v28 = vsel %vm3559_vm6, %v5886_v44, %v3226_v7  ;;  %v2749_v32 = vcombine.low %v6021_v8, %v6024_v11  ;;  %v2880_v4 = vrot.slane %v2866_v40, %v4223_v29  ;;  %v6738_v62 = vld [vmem:[#allocation79_spill] sm:$0xff] }
 0x264   : > { %v3509_v59 = vsel %vm3505_vm0, %v6734_v58, %v6731_v61  ;;  %3391 = vrot.lane.b32.xlu1 %v2477_v57, %s3974_s14  ;;  %3453 = vrot.lane.b32.xlu0 %v2343_v6, %s3976_s20  ;;  %v2977_v57 = vrot.slane %v2969_v37, %v4223_v29  ;;  %v3009_v6 = vrot.slane %v3001_v41, %v4223_v29 }
 0x265   : > { %v3518_v35 = vsel %vm3514_vm1, %v3509_v59, %v6735_v1  ;;  %v6739_v13 = vcombine.low %v6737_v9, %v6738_v62  ;;  %v2887_v58 = vcombine.low %v2848_v30, %v2880_v4  ;;  %v2970_v62 = vcombine.high %v5981_v14, %v5986_v17 }
 0x266   : > { %v3527_v12 = vsel %vm3523_vm2, %v3518_v35, %v5771_v53  ;;  %v3168_v49 = vpop.permute.xlu1 %3167  ;;  %v3230_v45 = vpop.permute.xlu0 %3229  ;;  %v6736_v53 = vld [vmem:[#allocation66_spill] sm:$0xff]  ;;  %v3021_v24 = vcombine.low %v2977_v57, %v3009_v6 }
 0x267   : > { %v3536_v44 = vsel %vm3532_vm3, %v3527_v12, %v5901_v42  ;;  %v3511_v7 = vsel %vm3505_vm0, %v6739_v13, %v6736_v53  ;;  %v3562_v36 = vsel %vm3559_vm6, %v5918_v46, %v3230_v45  ;;  %v2984_v14 = vrot.slane %v2970_v62, %v4223_v29 }
 0x268   : > { %v3545_v61 = vsel %vm3541_vm4, %v3536_v44, %v3168_v49  ;;  %v3520_v42 = vsel %vm3514_vm1, %v3511_v7, %v5658_v26  ;;  %3395 = vrot.lane.b32.xlu1 %v2749_v32, %s3974_s14  ;;  %3457 = vrot.lane.b32.xlu0 %v2615_v50, %s3976_s20  ;;  %v2478_v50 = vcombine.high %v5958_v31, %v5961_v22  ;;  %vm3681_vm0 = vcmask 523520  }
 0x269   : > { %v3529_v40 = vsel %vm3523_vm2, %v3520_v42, %v5808_v20  ;;  %v2206_v20 = vcombine.high %v5856_v19, %v5895_v47  ;;  %v2344_v19 = vcombine.high %v5910_v33, %v5921_v3  ;;  %v2154_v47 = vcombine.high %v5799_v48, %v5802_v38  ;;  %v6740_v38 = vld [vmem:[#allocation67_spill] sm:$0xff] }
 0x26a   : > { %v3538_v37 = vsel %vm3532_vm3, %v3529_v40, %v5949_v27  ;;  %v3172_v41 = vpop.permute.xlu1 %3171  ;;  %v3234_v16 = vpop.permute.xlu0 %3233  ;;  %v2072_v27 = vcombine.high %v5859_v39, %v5862_v51  ;;  %v2750_v31 = vcombine.high %v6021_v8, %v6024_v11  ;;  %v2616_v33 = vcombine.high %v6011_v54, %v6014_v5 }
 0x26b   : > { %v3547_v59 = vsel %vm3541_vm4, %v3538_v37, %v3172_v41  ;;  %v3564_v46 = vsel %vm3559_vm6, %v5955_v21, %v3234_v16  ;;  %v2426_v48 = vcombine.high %v5867_v52, %v5876_v18  ;;  %v3022_v8 = vcombine.high %v2977_v57, %v3009_v6 }
 0x26c   : > { %3399 = vrot.lane.b32.xlu1 %v3021_v24, %s3974_s14  ;;  %3461 = vrot.lane.b32.xlu0 %v2887_v58, %s3976_s20  ;;  %v2888_v11 = vcombine.high %v2848_v30, %v2880_v4  ;;  %v2168_v54 = vrot.slane %v2154_v47, %v4223_v29  ;;  %v2730_v30 = vcombine.high %v5934_v0, %v5937_v34 }
 0x26d   : > { %v2440_v52 = vrot.slane %v2426_v48, %v4223_v29 }
 0x26e   : > { %v3176_v26 = vpop.permute.xlu1 %3175  ;;  %v3238_v1 = vpop.permute.xlu0 %3237  ;;  %v2744_v34 = vrot.slane %v2730_v30, %v4223_v29 }
 0x26f   : > { %v3549_v35 = vsel %vm3541_vm4, %v3540_v25, %v3176_v26  ;;  %v3566_v12 = vsel %vm3559_vm6, %v3557_v43, %v3238_v1  ;;  %v2186_v25 = vcombine.high %v5818_v15, %v5821_v63  ;;  %v2458_v15 = vcombine.high %v6740_v38, %v5882_v55 }
 0x270   : > { %3419 = vrot.lane.b32.xlu1 %v2206_v20, %s3975_s16  ;;  %3481 = vrot.lane.b32.xlu0 %v2072_v27, %s3977_s21  ;;  %v2698_v55 = vcombine.high %v5924_v2, %v5927_v60  ;;  %v3002_v2 = vcombine.high %v5989_v23, %v5992_v10 }
 0x271   : > { %v2200_v5 = vrot.slane %v2186_v25, %v4223_v29  ;;  %v2472_v18 = vrot.slane %v2458_v15, %v4223_v29 }
 0x272   : > { %v3196_v21 = vpop.permute.xlu1 %3195  ;;  %v3258_v32 = vpop.permute.xlu0 %3257  ;;  %v2712_v0 = vrot.slane %v2698_v55, %v4223_v29  ;;  %v3016_v17 = vrot.slane %v3002_v2, %v4223_v29 }
 0x273   : > { %v3552_v39 = vsel %vm3550_vm5, %v3543_v56, %v3196_v21  ;;  %v3569_v51 = vsel %vm3568_vm7, %v3560_v28, %v3258_v32  ;;  %v2207_v6 = vcombine.low %v2168_v54, %v2200_v5  ;;  %v2479_v9 = vcombine.low %v2440_v52, %v2472_v18 }
 0x274   : > { %3423 = vrot.lane.b32.xlu1 %v2478_v50, %s3975_s16  ;;  %3485 = vrot.lane.b32.xlu0 %v2344_v19, %s3977_s21  ;;  %v2751_v40 = vcombine.low %v2712_v0, %v2744_v34  ;;  %v3023_v16 = vcombine.low %v2984_v14, %v3016_v17  ;;  %v2208_v26 = vcombine.high %v2168_v54, %v2200_v5 }
 0x275   : > { %v2752_v19 = vcombine.high %v2712_v0, %v2744_v34 }
 0x276   : > { %v3200_v43 = vpop.permute.xlu1 %3199  ;;  %v3262_v44 = vpop.permute.xlu0 %3261 }
 0x277   : > { %v3554_v3 = vsel %vm3550_vm5, %v3545_v61, %v3200_v43  ;;  %v3571_v22 = vsel %vm3568_vm7, %v3562_v36, %v3262_v44  ;;  %v3024_v43 = vcombine.high %v2984_v14, %v3016_v17 }
 0x278   : > { %3427 = vrot.lane.b32.xlu1 %v2750_v31, %s3975_s16  ;;  %3489 = vrot.lane.b32.xlu0 %v2616_v33, %s3977_s21 }
 0x27a   : > { %v3204_v63 = vpop.permute.xlu1 %3203  ;;  %v3266_v56 = vpop.permute.xlu0 %3265 }
 0x27b   : > { %v3556_v28 = vsel %vm3550_vm5, %v3547_v59, %v3204_v63  ;;  %v3573_v49 = vsel %vm3568_vm7, %v3564_v46, %v3266_v56 }
 0x27c   : > { %3431 = vrot.lane.b32.xlu1 %v3022_v8, %s3975_s16  ;;  %3493 = vrot.lane.b32.xlu0 %v2888_v11, %s3977_s21 }
 0x27e   : > { %v3208_v45 = vpop.permute.xlu1 %3207  ;;  %v3270_v57 = vpop.permute.xlu0 %3269 }
 0x27f   : > { %v3558_v4 = vsel %vm3550_vm5, %v3549_v35, %v3208_v45  ;;  %v3575_v53 = vsel %vm3568_vm7, %v3566_v12, %v3270_v57  ;;  %v2480_v35 = vcombine.high %v2440_v52, %v2472_v18 }
 0x280   : > { %3451 = vrot.lane.b32.xlu1 %v2207_v6, %s3976_s20 }
 0x282   : > { %v3228_v60 = vpop.permute.xlu1 %3227  ;;  %v3290_v13 = vpop.permute.xlu0 %3289 }
 0x283   : > { %v3561_v7 = vsel %vm3559_vm6, %v3552_v39, %v3228_v60  ;;  %v3578_v61 = vsel %vm3577_vm8, %v3569_v51, %v3290_v13 }
 0x284   : > { %3455 = vrot.lane.b32.xlu1 %v2479_v9, %s3976_s20 }
 0x286   : > { %v3232_v36 = vpop.permute.xlu1 %3231  ;;  %v3294_v42 = vpop.permute.xlu0 %3293 }
 0x287   : > { %v3563_v23 = vsel %vm3559_vm6, %v3554_v3, %v3232_v36  ;;  %v3580_v10 = vsel %vm3577_vm8, %v3571_v22, %v3294_v42 }
 0x288   : > { %3459 = vrot.lane.b32.xlu1 %v2751_v40, %s3976_s20 }
 0x28a   : > { %v3236_v37 = vpop.permute.xlu1 %3235  ;;  %v3298_v41 = vpop.permute.xlu0 %3297 }
 0x28b   : > { %v3565_v24 = vsel %vm3559_vm6, %v3556_v28, %v3236_v37  ;;  %v3582_v58 = vsel %vm3577_vm8, %v3573_v49, %v3298_v41 }
 0x28c   : > { %3463 = vrot.lane.b32.xlu1 %v3023_v16, %s3976_s20 }
 0x28e   : > { %v3240_v59 = vpop.permute.xlu1 %3239  ;;  %v3302_v46 = vpop.permute.xlu0 %3301 }
 0x28f   : > { %v3567_v29 = vsel %vm3559_vm6, %v3558_v4, %v3240_v59  ;;  %v3584_v1 = vsel %vm3577_vm8, %v3575_v53, %v3302_v46 }
 0x290   : > { %3483 = vrot.lane.b32.xlu1 %v2208_v26, %s3977_s21 }
 0x292   : > { %v3260_v20 = vpop.permute.xlu1 %3259  ;;  %v3322_v27 = vpop.permute.xlu0 %3321 }
 0x293   : > { %v3570_v12 = vsel %vm3568_vm7, %v3561_v7, %v3260_v20  ;;  %v3587_v21 = vsel %vm3586_vm9, %v3578_v61, %v3322_v27 }
 0x294   : > { %3487 = vrot.lane.b32.xlu1 %v2480_v35, %s3977_s21 }
 0x296   : > { %v3264_v32 = vpop.permute.xlu1 %3263  ;;  %v3326_v50 = vpop.permute.xlu0 %3325 }
 0x297   : > { %v3572_v39 = vsel %vm3568_vm7, %v3563_v23, %v3264_v32  ;;  %v6151_v51 = vsel %vm3586_vm9, %v3580_v10, %v3326_v50 }
 0x298   : > { %3491 = vrot.lane.b32.xlu1 %v2752_v19, %s3977_s21 }
 0x29a   : > { %v3268_v47 = vpop.permute.xlu1 %3267  ;;  %v3330_v25 = vpop.permute.xlu0 %3329 }
 0x29b   : > { %v3574_v44 = vsel %vm3568_vm7, %v3565_v24, %v3268_v47  ;;  %v6156_v31 = vsel %vm3586_vm9, %v3582_v58, %v3330_v25 }
 0x29c   : > { %3495 = vrot.lane.b32.xlu1 %v3024_v43, %s3977_s21 }
 0x29e   : > { %v3272_v33 = vpop.permute.xlu1 %3271  ;;  %v3334_v3 = vpop.permute.xlu0 %3333 }
 0x29f   : > { %v3576_v22 = vsel %vm3568_vm7, %v3567_v29, %v3272_v33  ;;  %v6161_v48 = vsel %vm3586_vm9, %v3584_v1, %v3334_v3 }
 0x2a2   : > { %v3292_v38 = vpop.permute.xlu1 %3291  ;;  %v3354_v15 = vpop.permute.xlu0 %3353 }
 0x2a3   : > { %v3579_v63 = vsel %vm3577_vm8, %v3570_v12, %v3292_v38  ;;  %v3596_v59 = vsel %vm3595_vm10, %v3587_v21, %v3354_v15 }
 0x2a6   : > { %v3296_v56 = vpop.permute.xlu1 %3295  ;;  %v3358_v8 = vpop.permute.xlu0 %3357 }
 0x2a7   : > { %v3581_v11 = vsel %vm3577_vm8, %v3572_v39, %v3296_v56  ;;  %v3598_v27 = vsel %vm3595_vm10, %v6151_v51, %v3358_v8 }
 0x2aa   : > { %v3300_v54 = vpop.permute.xlu1 %3299  ;;  %v3362_v5 = vpop.permute.xlu0 %3361 }
 0x2ab   : > { %v3583_v28 = vsel %vm3577_vm8, %v3574_v44, %v3300_v54  ;;  %v3600_v39 = vsel %vm3595_vm10, %v6156_v31, %v3362_v5 }
 0x2ae   : > { %v3304_v49 = vpop.permute.xlu1 %3303  ;;  %v6166_v52 = vpop.permute.xlu0 %3365 }
 0x2af   : > { %v3585_v18 = vsel %vm3577_vm8, %v3576_v22, %v3304_v49  ;;  %v3602_v3 = vsel %vm3595_vm10, %v6161_v48, %v6166_v52 }
 0x2b2   : > { %v3324_v55 = vpop.permute.xlu1 %3323  ;;  %v3386_v30 = vpop.permute.xlu0 %3385 }
 0x2b3   : > { %v6170_v45 = vsel %vm3586_vm9, %v3579_v63, %v3324_v55  ;;  %v3605_v46 = vsel %vm3604_vm11, %v3596_v59, %v3386_v30 }
 0x2b6   : > { %v3328_v57 = vpop.permute.xlu1 %3327  ;;  %v3390_v6 = vpop.permute.xlu0 %3389 }
 0x2b7   : > { %v6173_v4 = vsel %vm3586_vm9, %v3581_v11, %v3328_v57  ;;  %v3607_v12 = vsel %vm3604_vm11, %v3598_v27, %v3390_v6 }
 0x2ba   : > { %v3332_v53 = vpop.permute.xlu1 %3331  ;;  %v3394_v9 = vpop.permute.xlu0 %3393 }
 0x2bb   : > { %v6176_v62 = vsel %vm3586_vm9, %v3583_v28, %v3332_v53  ;;  %v3609_v47 = vsel %vm3604_vm11, %v3600_v39, %v3394_v9 }
 0x2be   : > { %v3336_v2 = vpop.permute.xlu1 %3335  ;;  %v3398_v60 = vpop.permute.xlu0 %3397 }
 0x2bf   : > { %v6179_v13 = vsel %vm3586_vm9, %v3585_v18, %v3336_v2  ;;  %v3611_v22 = vsel %vm3604_vm11, %v3602_v3, %v3398_v60 }
 0x2c2   : > { %v6181_v0 = vpop.permute.xlu1 %3355  ;;  %v3418_v34 = vpop.permute.xlu0 %3417 }
 0x2c3   : > { %v3614_v26 = vsel %vm3613_vm12, %v3605_v46, %v3418_v34  ;;  %v3597_v28 = vsel %vm3595_vm10, %v6170_v45, %v6181_v0 }
 0x2c6   : > { %v6183_v7 = vpop.permute.xlu1 %3359  ;;  %v3422_v61 = vpop.permute.xlu0 %3421 }
 0x2c7   : > { %v3616_v21 = vsel %vm3613_vm12, %v3607_v12, %v3422_v61  ;;  %v3599_v30 = vsel %vm3595_vm10, %v6173_v4, %v6183_v7 }
 0x2ca   : > { %v6185_v36 = vpop.permute.xlu1 %3363  ;;  %v3426_v42 = vpop.permute.xlu0 %3425 }
 0x2cb   : > { %v3618_v25 = vsel %vm3613_vm12, %v3609_v47, %v3426_v42  ;;  %v3601_v2 = vsel %vm3595_vm10, %v6176_v62, %v6185_v36 }
 0x2ce   : > { %v6187_v40 = vpop.permute.xlu1 %3367  ;;  %v3430_v14 = vpop.permute.xlu0 %3429 }
 0x2cf   : > { %v3620_v38 = vsel %vm3613_vm12, %v3611_v22, %v3430_v14  ;;  %v3603_v62 = vsel %vm3595_vm10, %v6179_v13, %v6187_v40 }
 0x2d2   : > { %v3388_v17 = vpop.permute.xlu1 %3387  ;;  %v3450_v23 = vpop.permute.xlu0 %3449 }
 0x2d3   : > { %v3623_v29 = vsel %vm3622_vm13, %v3614_v26, %v3450_v23  ;;  %v3606_v49 = vsel %vm3604_vm11, %v3597_v28, %v3388_v17 }
 0x2d6   : > { %v3392_v10 = vpop.permute.xlu1 %3391  ;;  %v3454_v37 = vpop.permute.xlu0 %3453 }
 0x2d7   : > { %v3625_v32 = vsel %vm3622_vm13, %v3616_v21, %v3454_v37  ;;  %v3608_v6 = vsel %vm3604_vm11, %v3599_v30, %v3392_v10 }
 0x2da   : > { %v6189_v41 = vpop.permute.xlu1 %3395  ;;  %v3458_v16 = vpop.permute.xlu0 %3457 }
 0x2db   : > { %v3627_v43 = vsel %vm3622_vm13, %v3618_v25, %v3458_v16  ;;  %v3610_v60 = vsel %vm3604_vm11, %v3601_v2, %v6189_v41 }
 0x2de   : > { %v6191_v24 = vpop.permute.xlu1 %3399  ;;  %v3462_v58 = vpop.permute.xlu0 %3461 }
 0x2df   : > { %v3629_v15 = vsel %vm3622_vm13, %v3620_v38, %v3462_v58  ;;  %v3612_v36 = vsel %vm3604_vm11, %v3603_v62, %v6191_v24 }
 0x2e2   : > { %v3420_v1 = vpop.permute.xlu1 %3419  ;;  %v3482_v20 = vpop.permute.xlu0 %3481 }
 0x2e3   : > { %v3632_v35 = vsel %vm3631_vm14, %v3623_v29, %v3482_v20  ;;  %v3615_v52 = vsel %vm3613_vm12, %v3606_v49, %v3420_v1 }
 0x2e4   : > { %3641 = vst.msk [vmem:[%s6203_s22] sm:$0xff] %vm3640_vm15, %v3632_v35  ;;  %3657 = vrot.lane.b32.xlu0 %v3632_v35, %s3978_s26 }
 0x2e6   : > { %v3424_v50 = vpop.permute.xlu1 %3423  ;;  %v3486_v19 = vpop.permute.xlu0 %3485 }
 0x2e7   : > { %v3634_v51 = vsel %vm3631_vm14, %v3625_v32, %v3486_v19  ;;  %v3617_v45 = vsel %vm3613_vm12, %v3608_v6, %v3424_v50 }
 0x2e8   : > { %3643 = vst.msk [vmem:[%s6203_s22 + $0x10] sm:$0xff] %vm3640_vm15, %v3634_v51  ;;  %3661 = vrot.lane.b32.xlu0 %v3634_v51, %s3978_s26 }
 0x2ea   : > { %v3428_v44 = vpop.permute.xlu1 %3427  ;;  %v3490_v33 = vpop.permute.xlu0 %3489 }
 0x2eb   : > { %v3636_v31 = vsel %vm3631_vm14, %v3627_v43, %v3490_v33  ;;  %v3619_v0 = vsel %vm3613_vm12, %v3610_v60, %v3428_v44 }
 0x2ec   : > { %3645 = vst.msk [vmem:[%s6203_s22 + $0x20] sm:$0xff] %vm3640_vm15, %v3636_v31  ;;  %3665 = vrot.lane.b32.xlu0 %v3636_v31, %s3978_s26 }
 0x2ee   : > { %v3432_v63 = vpop.permute.xlu1 %3431  ;;  %v3494_v56 = vpop.permute.xlu0 %3493 }
 0x2ef   : > { %v3638_v8 = vsel %vm3631_vm14, %v3629_v15, %v3494_v56  ;;  %v3621_v42 = vsel %vm3613_vm12, %v3612_v36, %v3432_v63 }
 0x2f0   : > { %3647 = vst.msk [vmem:[%s6203_s22 + $0x30] sm:$0xff] %vm3640_vm15, %v3638_v8  ;;  %3669 = vrot.lane.b32.xlu0 %v3638_v8, %s3978_s26 }
 0x2f2   : > { %v3452_v48 = vpop.permute.xlu1 %3451 }
 0x2f3   : > { %v3624_v18 = vsel %vm3622_vm13, %v3615_v52, %v3452_v48 }
 0x2f6   : > { %v3456_v11 = vpop.permute.xlu1 %3455 }
 0x2f7   : > { %v3626_v53 = vsel %vm3622_vm13, %v3617_v45, %v3456_v11 }
 0x2fa   : > { %v3460_v54 = vpop.permute.xlu1 %3459 }
 0x2fb   : > { %v3628_v34 = vsel %vm3622_vm13, %v3619_v0, %v3460_v54 }
 0x2fe   : > { %v3464_v5 = vpop.permute.xlu1 %3463 }
 0x2ff   : > { %v3630_v14 = vsel %vm3622_vm13, %v3621_v42, %v3464_v5 }
 0x302   : > { %v3484_v55 = vpop.permute.xlu1 %3483 }
 0x303   : > { %v3633_v57 = vsel %vm3631_vm14, %v3624_v18, %v3484_v55 }
 0x304   : > { %3642 = vst.msk [vmem:[%s6203_s22 + $0x8] sm:$0xff] %vm3640_vm15, %v3633_v57  ;;  %3659 = vrot.lane.b32.xlu1 %v3633_v57, %s3978_s26 }
 0x306   : > { %v3488_v9 = vpop.permute.xlu1 %3487 }
 0x307   : > { %v3635_v4 = vsel %vm3631_vm14, %v3626_v53, %v3488_v9 }
 0x308   : > { %3644 = vst.msk [vmem:[%s6203_s22 + $0x18] sm:$0xff] %vm3640_vm15, %v3635_v4  ;;  %3663 = vrot.lane.b32.xlu1 %v3635_v4, %s3978_s26 }
 0x30a   : > { %v3492_v7 = vpop.permute.xlu1 %3491 }
 0x30b   : > { %v3637_v61 = vsel %vm3631_vm14, %v3628_v34, %v3492_v7 }
 0x30c   : > { %3646 = vst.msk [vmem:[%s6203_s22 + $0x28] sm:$0xff] %vm3640_vm15, %v3637_v61  ;;  %3667 = vrot.lane.b32.xlu1 %v3637_v61, %s3978_s26 }
 0x30e   : > { %v3496_v17 = vpop.permute.xlu1 %3495 }
 0x30f   : > { %v3639_v13 = vsel %vm3631_vm14, %v3630_v14, %v3496_v17 }
 0x310   : > { %3648 = vst.msk [vmem:[%s6203_s22 + $0x38] sm:$0xff] %vm3640_vm15, %v3639_v13  ;;  %3671 = vrot.lane.b32.xlu1 %v3639_v13, %s3978_s26 }
 0x356   : > { %v3658_v40 = vpop.permute.xlu0 %3657 }
 0x357   : > { %3682 = vst.msk [vmem:[%s6203_s22] sm:$0xff] %vm3681_vm0, %v3658_v40 }
 0x35a   : > { %v3662_v23 = vpop.permute.xlu0 %3661 }
 0x35b   : > { %3684 = vst.msk [vmem:[%s6203_s22 + $0x10] sm:$0xff] %vm3681_vm0, %v3662_v23 }
 0x35e   : > { %v3666_v10 = vpop.permute.xlu0 %3665 }
 0x35f   : > { %3686 = vst.msk [vmem:[%s6203_s22 + $0x20] sm:$0xff] %vm3681_vm0, %v3666_v10 }
 0x362   : > { %v3670_v37 = vpop.permute.xlu0 %3669 }
 0x363   : > { %3688 = vst.msk [vmem:[%s6203_s22 + $0x30] sm:$0xff] %vm3681_vm0, %v3670_v37 }
 0x376   : > { %v3660_v41 = vpop.permute.xlu1 %3659 }
 0x377   : > { %3683 = vst.msk [vmem:[%s6203_s22 + $0x8] sm:$0xff] %vm3681_vm0, %v3660_v41 }
 0x37a   : > { %v3664_v16 = vpop.permute.xlu1 %3663 }
 0x37b   : > { %3685 = vst.msk [vmem:[%s6203_s22 + $0x18] sm:$0xff] %vm3681_vm0, %v3664_v16 }
 0x37e   : > { %v3668_v24 = vpop.permute.xlu1 %3667 }
 0x37f   : > { %3687 = vst.msk [vmem:[%s6203_s22 + $0x28] sm:$0xff] %vm3681_vm0, %v3668_v24 }
 0x382   : > { %v3672_v58 = vpop.permute.xlu1 %3671 }
 0x383   : > { %3689 = vst.msk [vmem:[%s6203_s22 + $0x38] sm:$0xff] %vm3681_vm0, %v3672_v58 }
 0x384   : > { %3903 = shalt.err (!%p3900_p2)
}
 0x385   : > { %s3904_s5 = scalar_lea.hbm %s6294_s27, 1024  ;;  %s3908_s14 = scalar_lea.hbm %s6344_s1, 2048 }
 0x386   : > { %p3905_p4 = scmp.ne.s32.totalorder %s6294_s27, %s3904_s5  ;;  %p3909_p9 = scmp.lt.u32.totalorder %s6294_s27, %s6344_s1 }
 0x387   : > { %p3910_p1 = scmp.lt.u32.totalorder %s3908_s14, %s3904_s5  ;;  %p3912_p6 = scmp.lt.u32.totalorder %s3904_s5, %s6294_s27 }
 0x388   : > { %p3906_p5 = pnand %p3905_p4, %p6741_p11 }
 0x389   : > { %p3911_p3 = por %p3910_p1, %p3909_p9 }
 0x38a   : > { %p3907_p7 = pneg %p3906_p5 }
 0x38b   : > { %p3913_p12 = por %p3912_p6, %p3911_p3 }
 0x38d   : > { %p3914_p13 = pnand %p3913_p12, %p3907_p7 }
 0x38f   : > { %3917 = shalt.err (!%p3914_p13)
}
 0x390   : > { %s3980_s21 = smov 128  }
 0x391   : > { %3795 = dma.vmem_to_hbm [thread:$0]  (%p6741_p11), %s6296_s30, 1024, %s6294_s27, %s3691_s29, %s3980_s21, %s3980_s21, %s3966_s28  }
 0x392 PF: > { %s3719_s22 = sand.u32 1, %s3944_s6   ;;  %p6742_p8 = scmp.ne.s32.totalorder %s6453_s19, 0 }
 0x393   : > { %p6743_p10 = scmp.ge.s32.totalorder %s3956_s9, 2  ;;  %s3720_s26 = scalar_lea.sflag [#allocation4], %s3719_s22 }
 0x395   : > { %p3802_p0 = pnand %p6743_p10, %p6742_p8 }
 0x397   : > { %3939 = dma.done.wait (!%p3802_p0), %s3720_s26, 1024  }
 0x398   : > { %3941 = vsyncadd (!%p3802_p0), %s3720_s26, 4294966272  ;;  %p14_p2 = scmp.ge.s32.totalorder %s4016_s12, 4   ;;  %s6744_s6 = smov %s3948_s7 }
 0x399   : > { %s6745_s7 = smov %s3952_s8  ;;  %s6746_s8 = smov %s4028_s15 }
 0x39a   : > { %s6747_s9 = smov %s4016_s12  ;;  %16 = sbr.rel (!%p14_p2) target bundleno = 5 (0x5), region = 69 }
 0x3a1   :  { %3725 = vsyncpa [#allocation3], 1 }
 0x3a2   :  { %3727 = vsyncpa [#allocation3 + $0x1], 1 }
 0x3a3   :  { %3728 = vsyncpa [#allocation4], 1 }
 0x3a4   :  { %3730 = vsyncpa [#allocation4 + $0x1], 1 }

</bundles_post_ra>
